<compile_context>
chip_gen: v7x
topology: tpu7x:2x2x1
jax: 0.10.0
libtpu: 0.0.40
codegen_flags: <defaults>
</compile_context>

<pallas_src>
import functools

import jax
import jax.numpy as jnp
from jax.experimental import pallas as pl
from jax.experimental.pallas import tpu as pltpu


def _conv_dw_kernel(*refs, stride, tap_dtype):
    """One (batch, row-tile) per grid step.

    refs (stride==1): x_mid, x_up, x_dn, wdw, wpw, b1, b2, out, xpad
    refs (stride==2): x_mid, x_up,        wdw, wpw, b1, b2, out, xpad

    x_mid : (1, TH*stride, W+2, C) bf16  body rows (W already zero-padded)
    x_up  : (1, 1, W+2, C)         bf16  row just above the body (halo)
    x_dn  : (1, 1, W+2, C)         bf16  row just below the body (stride-1 only)
    wdw   : (3, 3, C)              f32   depthwise weights (BN1 scale folded)
    wpw   : (C, Cp)                bf16  pointwise weights (BN2 scale folded,
                                         columns zero-padded to Cp)
    b1    : (1, 1, C)              f32   BN1 bias
    b2    : (1, 1, Cp)             f32   BN2 bias (zero-padded)
    out   : (1, TH, Wo, Cp)        bf16  output tile (lane-dense, Cp % 128 == 0)
    xpad  : (TH_in, W+2, C)        bf16  VMEM scratch: row-padded input tile
    """
    if stride == 1:
        (x_mid_ref, x_up_ref, x_dn_ref,
         wdw_ref, wpw_ref, b1_ref, b2_ref, o_ref, xpad_ref) = refs
    else:
        (x_mid_ref, x_up_ref,
         wdw_ref, wpw_ref, b1_ref, b2_ref, o_ref, xpad_ref) = refs
        x_dn_ref = None

    THs = x_mid_ref.shape[1]                       # TH * stride body rows
    _, TH, Wo, Cp = o_ref.shape
    TH_in, Wp, C = xpad_ref.shape
    t = pl.program_id(1)
    nT = pl.num_programs(1)

    # ---- Assemble the row-padded tile in bf16 VMEM (W pre-padded in HBM) ----
    # Full-width, leading-dim-aligned writes only: no sublane-offset masked vst.
    xpad_ref[1:1 + THs, :, :] = x_mid_ref[0]
    # Top halo row: zeroed on the first row tile of the image.
    xpad_ref[0:1, :, :] = jnp.where(t > 0, x_up_ref[0], 0.0).astype(xpad_ref.dtype)
    if stride == 1:
        # Bottom halo row (stride 1 only): zeroed on the last row tile.
        xpad_ref[TH_in - 1:TH_in, :, :] = jnp.where(
            t < nT - 1, x_dn_ref[0], 0.0).astype(xpad_ref.dtype)

    # ---- Depthwise 3x3: hoisted column shifts, 9 taps in tap_dtype ----
    wdw = wdw_ref[...].astype(tap_dtype)           # (3, 3, C)
    acc = jnp.zeros((TH, Wo, C), tap_dtype)
    row_span = (TH - 1) * stride + 1
    for kw in range(3):                            # 3 sublane-shifted slabs, not 9
        if stride == 1:
            slab = xpad_ref[:, kw:kw + Wo, :]
        else:
            slab = xpad_ref[:, kw:kw + 2 * Wo - 1, :][:, ::2, :]
        slab = slab.astype(tap_dtype)              # (TH_in, Wo, C)
        for kh in range(3):
            patch = slab[kh:kh + row_span:stride]  # leading-dim slice: no relayout
            acc = acc + patch * wdw[kh, kw]

    # BN1 bias (scale already folded into wdw) + ReLU; feed the MXU in bf16.
    y = jnp.maximum(acc + b1_ref[...].astype(tap_dtype)[0], 0.0)
    y = y.reshape(TH * Wo, C).astype(jnp.bfloat16)

    # ---- Pointwise 1x1 conv == bf16 MXU matmul (BN2 scale folded into wpw) ----
    y2 = jnp.dot(y, wpw_ref[...], preferred_element_type=jnp.float32)
    y2 = jnp.maximum(y2 + b2_ref[0], 0.0)          # BN2 bias + ReLU
    o_ref[...] = y2.reshape(1, TH, Wo, Cp).astype(o_ref.dtype)


def _tpu_generation():
    """Best-effort (vmem_capacity_bytes, has_bf16_valu) for the default device."""
    try:
        kind = jax.devices()[0].device_kind.lower()
    except Exception:
        kind = ""
    if "v7" in kind or "tpu7" in kind:
        cap, bf16_valu = 64 * 1024 * 1024, True     # v7x: 64 MiB VMEM / TC
    elif "v6" in kind:
        cap, bf16_valu = 128 * 1024 * 1024, True    # v6e: 128 MiB, bf16 VPU
    elif "v5" in kind or "v4" in kind:
        cap, bf16_valu = 128 * 1024 * 1024, False   # v5e/v5p/v4: no bf16 VALU
    else:
        cap, bf16_valu = 64 * 1024 * 1024, False    # unknown: conservative
    try:
        cap = int(pltpu.get_tpu_info().vmem_capacity_bytes)
    except Exception:
        pass
    return cap, bf16_valu


def _pick_row_tile(Ho, W, C, Cp, stride, budget_bytes, min_tiles=1):
    """Largest row tile TH (divisor of Ho) whose working set fits the budget.

    Counts double-buffered bf16 input/output blocks, the resident weights
    (wpw/wdw/b1/b2), the bf16 padded scratch and the per-step live
    intermediates (f32 worst case).  min_tiles keeps at least that many grid
    steps along the row axis (when possible) so both v7x TensorCores get work
    even at batch 1.
    """
    Wo = (W - 1) // stride + 1
    Wp = W + 2
    resident = 2 * (C * Cp * 2 + 9 * C * 4 + C * 4 + Cp * 4)
    best = 1
    for th in range(1, Ho + 1):
        if Ho % th:
            continue
        if th > 1 and Ho // th < min_tiles:
            continue
        th_in = (th - 1) * stride + 3
        est = (2 * th * stride * Wp * C * 2        # body block, double-buffered, bf16
               + 2 * 2 * Wp * C * 2                # halo rows, double-buffered, bf16
               + 2 * th * Wo * Cp * 2              # output block, double-buffered, bf16
               + th_in * Wp * C * 2                # padded bf16 scratch
               + th_in * Wo * C * 4                # one live column slab (f32 worst)
               + th * Wo * (C + 2 * Cp) * 4        # acc + matmul result + staging
               + resident)
        if est <= budget_bytes:
            best = th
    return best


def conv_dw_forward(x_nchw, w_dw, w_pw, bn1, bn2, *, stride=1, eps=1e-5,
                    tap_dtype=None, nchw_float32_out=True):
    """x_nchw: (N, C, H, W).  w_dw: (3, 3, C).  w_pw: (C, Cout).
    bn1/bn2: dicts with gamma, beta, mean, var (inference-mode BN).

    tap_dtype: depthwise accumulate dtype; None = bf16 on chips with a bf16
    VPU (v6e/v7x), f32 otherwise.  nchw_float32_out=False returns NHWC bf16
    (skips the final transpose + f32-cast HBM pass for chained blocks)."""
    N, C, H, W = x_nchw.shape
    Cout = w_pw.shape[1]
    assert stride in (1, 2), "MobileNet conv_dw uses stride 1 or 2"
    if stride == 2:
        assert H % 2 == 0 and W % 2 == 0, "stride-2 path assumes even H/W"
    Ho = (H - 1) // stride + 1
    Wo = (W - 1) // stride + 1
    Cp = ((Cout + 127) // 128) * 128         # lane-dense output / full MXU N dim

    vmem_cap, bf16_valu = _tpu_generation()
    if tap_dtype is None:
        tap_dtype = jnp.bfloat16 if bf16_valu else jnp.float32

    # bf16 activations in HBM; the 1-column W zero-pad is fused into this
    # transpose+cast pass (no separate pad pass, no in-kernel column writes).
    x = jnp.transpose(x_nchw, (0, 2, 3, 1)).astype(jnp.bfloat16)   # NHWC
    x = jnp.pad(x, ((0, 0), (0, 0), (1, 1), (0, 0)))               # (N, H, W+2, C)
    Wp = W + 2

    # Fold inference BN scales into the conv weights (free, trace-time).
    s1 = bn1["gamma"] / jnp.sqrt(bn1["var"] + eps)
    s2 = bn2["gamma"] / jnp.sqrt(bn2["var"] + eps)
    wdw_f = (w_dw * s1).astype(jnp.float32)                        # (3,3,C)
    wpw_f = (w_pw * s2).astype(jnp.bfloat16)                       # (C,Cout)
    b1 = (bn1["beta"] - bn1["mean"] * s1).astype(jnp.float32).reshape(1, 1, C)
    b2 = (bn2["beta"] - bn2["mean"] * s2).astype(jnp.float32).reshape(1, 1, Cout)
    # Zero-pad the pointwise columns to Cp (trimmed again in the wrapper).
    wpw_p = jnp.pad(wpw_f, ((0, 0), (0, Cp - Cout)))
    b2_p = jnp.pad(b2, ((0, 0), (0, 0), (0, Cp - Cout)))

    # Generation-aware tile budget (~3/8 of physical VMEM) and VMEM limit.
    budget = min((vmem_cap * 3) // 8, 48 * 1024 * 1024)
    vmem_limit = min((vmem_cap * 3) // 4, 2 * budget)
    min_tiles = 2 if N == 1 else 1           # keep both v7x TCs busy at batch 1
    TH = _pick_row_tile(Ho, W, C, Cp, stride, budget, min_tiles)
    T = Ho // TH
    THs = TH * stride
    TH_in = (TH - 1) * stride + 3

    body_spec = pl.BlockSpec((1, THs, Wp, C), lambda n, t: (n, t, 0, 0))
    up_spec = pl.BlockSpec(
        (1, 1, Wp, C), lambda n, t: (n, jnp.maximum(t * THs - 1, 0), 0, 0))
    inputs = [x, x]
    in_specs = [body_spec, up_spec]
    if stride == 1:
        dn_spec = pl.BlockSpec(
            (1, 1, Wp, C), lambda n, t: (n, jnp.minimum((t + 1) * THs, H - 1), 0, 0))
        inputs.append(x)
        in_specs.append(dn_spec)
    # else: the stride-2 path never reads a bottom halo -> no DMA / buffers.
    inputs += [wdw_f, wpw_p, b1, b2_p]
    in_specs += [
        # Weights / biases: constant index maps -> stay resident in VMEM.
        pl.BlockSpec((3, 3, C), lambda n, t: (0, 0, 0)),
        pl.BlockSpec((C, Cp), lambda n, t: (0, 0)),
        pl.BlockSpec((1, 1, C), lambda n, t: (0, 0, 0)),
        pl.BlockSpec((1, 1, Cp), lambda n, t: (0, 0, 0)),
    ]

    out_nhwc = pl.pallas_call(
        functools.partial(_conv_dw_kernel, stride=stride, tap_dtype=tap_dtype),
        out_shape=jax.ShapeDtypeStruct((N, Ho, Wo, Cp), jnp.bfloat16),
        grid=(N, T),
        in_specs=in_specs,
        out_specs=pl.BlockSpec((1, TH, Wo, Cp), lambda n, t: (n, t, 0, 0)),
        scratch_shapes=[pltpu.VMEM((TH_in, Wp, C), jnp.bfloat16)],
        compiler_params=pltpu.CompilerParams(
            dimension_semantics=("parallel", "parallel"),
            vmem_limit_bytes=vmem_limit),
    )(*inputs)

    out = out_nhwc[..., :Cout]               # trim the lane padding (fuses below)
    if nchw_float32_out:
        # NHWC bf16 -> NCHW f32 to match the PyTorch convention.
        out = jnp.transpose(out, (0, 3, 1, 2)).astype(jnp.float32)
    return out


def _reference_forward(x_nchw, w_dw, w_pw, bn1, bn2, *, stride=1, eps=1e-5):
    """Pure-JAX reference (lax conv, f32 accumulation), mirroring the kernel's
    bf16 activation/weight cast points."""
    N, C, H, W = x_nchw.shape
    x = jnp.transpose(x_nchw, (0, 2, 3, 1)).astype(jnp.bfloat16).astype(jnp.float32)
    s1 = bn1["gamma"] / jnp.sqrt(bn1["var"] + eps)
    s2 = bn2["gamma"] / jnp.sqrt(bn2["var"] + eps)
    b1 = bn1["beta"] - bn1["mean"] * s1
    b2 = bn2["beta"] - bn2["mean"] * s2
    wd = (w_dw * s1).astype(jnp.float32).reshape(3, 3, 1, C)
    wp = (w_pw * s2).astype(jnp.bfloat16).astype(jnp.float32)
    y = jax.lax.conv_general_dilated(
        x, wd, window_strides=(stride, stride), padding=((1, 1), (1, 1)),
        dimension_numbers=("NHWC", "HWIO", "NHWC"), feature_group_count=C)
    y = jnp.maximum(y + b1, 0.0)
    y = y.astype(jnp.bfloat16).astype(jnp.float32)
    y = jnp.einsum("nhwc,cd->nhwd", y, wp)
    y = jnp.maximum(y + b2, 0.0)
    return jnp.transpose(y, (0, 3, 1, 2))


if __name__ == "__main__":
    # Small shapes consistent with the module: N=2, in_ch=4, out_ch=8, 16x16.
    N, Cin, Cout, H, W = 2, 4, 8, 16, 16
    stride = 1

    key = jax.random.PRNGKey(0)
    keys = jax.random.split(key, 11)

    x = jax.random.normal(keys[0], (N, Cin, H, W), jnp.float32)
    # Depthwise weight: PyTorch (Cin, 1, 3, 3) -> kernel layout (3, 3, Cin).
    w_dw = jax.random.normal(keys[1], (3, 3, Cin), jnp.float32) * 0.2
    # Pointwise weight: PyTorch (Cout, Cin, 1, 1) -> kernel layout (Cin, Cout).
    w_pw = jax.random.normal(keys[2], (Cin, Cout), jnp.float32) * 0.2

    bn1 = {
        "gamma": jax.random.uniform(keys[3], (Cin,), minval=0.5, maxval=1.5),
        "beta": jax.random.normal(keys[4], (Cin,)) * 0.1,
        "mean": jax.random.normal(keys[5], (Cin,)) * 0.1,
        "var": jax.random.uniform(keys[6], (Cin,), minval=0.5, maxval=1.5),
    }
    bn2 = {
        "gamma": jax.random.uniform(keys[7], (Cout,), minval=0.5, maxval=1.5),
        "beta": jax.random.normal(keys[8], (Cout,)) * 0.1,
        "mean": jax.random.normal(keys[9], (Cout,)) * 0.1,
        "var": jax.random.uniform(keys[10], (Cout,), minval=0.5, maxval=1.5),
    }

    ref = _reference_forward(x, w_dw, w_pw, bn1, bn2, stride=stride)

    # 1) f32-tap path: tight check of the Pallas mechanics (tiling, halos,
    #    lane-padded output, BN folding) against the f32 lax reference.
    fwd_f32 = jax.jit(functools.partial(conv_dw_forward, stride=stride,
                                        tap_dtype=jnp.float32))
    out_f32 = fwd_f32(x, w_dw, w_pw, bn1, bn2)
    jax.block_until_ready(out_f32)
    assert out_f32.shape == (N, Cout, H // stride, W // stride), out_f32.shape
    err_f32 = float(jnp.max(jnp.abs(out_f32 - ref)))
    assert jnp.allclose(out_f32, ref, rtol=2e-2, atol=2e-2), err_f32

    # 2) Device-default tap dtype (bf16 on v6e/v7x, f32 on v5e): the 9-tap
    #    bf16 accumulation loses ~3 mantissa bits, hence the looser tolerance.
    fwd = jax.jit(functools.partial(conv_dw_forward, stride=stride))
    out = fwd(x, w_dw, w_pw, bn1, bn2)
    jax.block_until_ready(out)
    assert out.shape == (N, Cout, H // stride, W // stride), out.shape
    err = float(jnp.max(jnp.abs(out - ref)))
    assert jnp.allclose(out, ref, rtol=7e-2, atol=7e-2), err

    print("KERNEL_OK")
</pallas_src>

<mosaic_0001>
module attributes {stable_mosaic.version = 11 : i64} {
  func.func @_conv_dw_kernel(%arg0: i32, %arg1: i32, %arg2: memref<1x16x18x4xbf16, #tpu.memory_space<vmem>>, %arg3: memref<1x1x18x4xbf16, #tpu.memory_space<vmem>>, %arg4: memref<1x1x18x4xbf16, #tpu.memory_space<vmem>>, %arg5: memref<3x3x4xf32, #tpu.memory_space<vmem>>, %arg6: memref<4x128xbf16, #tpu.memory_space<vmem>>, %arg7: memref<1x1x4xf32, #tpu.memory_space<vmem>>, %arg8: memref<1x1x128xf32, #tpu.memory_space<vmem>>, %arg9: memref<1x16x16x128xbf16, #tpu.memory_space<vmem>>, %arg10: memref<18x18x4xbf16, #tpu.memory_space<vmem>>) attributes {dimension_semantics = [#tpu.dimension_semantics<parallel>, #tpu.dimension_semantics<parallel>], iteration_bounds = array<i64: 2, 1>, scalar_prefetch = 0 : i64, scratch_operands = 1 : i64, tpu.core_type = #tpu.core_type<tc>, window_params = [{transform_indices = @transform_0, window_bounds = array<i64: 1, 16, 18, 4>}, {transform_indices = @transform_1, window_bounds = array<i64: 1, 1, 18, 4>}, {transform_indices = @transform_2, window_bounds = array<i64: 1, 1, 18, 4>}, {pipeline_mode = #tpu.pipeline_mode<synchronous>, transform_indices = @transform_3, window_bounds = array<i64: 3, 3, 4>}, {pipeline_mode = #tpu.pipeline_mode<synchronous>, transform_indices = @transform_4, window_bounds = array<i64: 4, 128>}, {pipeline_mode = #tpu.pipeline_mode<synchronous>, transform_indices = @transform_5, window_bounds = array<i64: 1, 1, 4>}, {pipeline_mode = #tpu.pipeline_mode<synchronous>, transform_indices = @transform_6, window_bounds = array<i64: 1, 1, 128>}, {transform_indices = @transform_7, window_bounds = array<i64: 1, 16, 16, 128>}]} {
    %c0 = arith.constant 0 : index
    %c0_0 = arith.constant 0 : index
    %c0_1 = arith.constant 0 : index
    %c0_2 = arith.constant 0 : index
    %0 = vector.load %arg2[%c0, %c0_0, %c0_1, %c0_2] : memref<1x16x18x4xbf16, #tpu.memory_space<vmem>>, vector<1x16x18x4xbf16>
    %1 = vector.shape_cast %0 : vector<1x16x18x4xbf16> to vector<16x18x4xbf16>
    %c1 = arith.constant 1 : index
    %c0_3 = arith.constant 0 : index
    %c0_4 = arith.constant 0 : index
    %2 = vector.load %arg10[%c1, %c0_3, %c0_4] : memref<18x18x4xbf16, #tpu.memory_space<vmem>>, vector<16x18x4xbf16>
    tpu.vector_store %arg10[%c1, %c0_3, %c0_4], %1 {strides = array<i32>} : memref<18x18x4xbf16, #tpu.memory_space<vmem>>, vector<16x18x4xbf16>,
    %c0_i32 = arith.constant 0 : i32
    %3 = arith.cmpi sgt, %arg1, %c0_i32 : i32
    %c0_5 = arith.constant 0 : index
    %c0_6 = arith.constant 0 : index
    %c0_7 = arith.constant 0 : index
    %c0_8 = arith.constant 0 : index
    %4 = vector.load %arg3[%c0_5, %c0_6, %c0_7, %c0_8] : memref<1x1x18x4xbf16, #tpu.memory_space<vmem>>, vector<1x1x18x4xbf16>
    %5 = vector.shape_cast %4 : vector<1x1x18x4xbf16> to vector<1x18x4xbf16>
    %cst = arith.constant 0.000000e+00 : f32
    %6 = arith.truncf %cst : f32 to bf16
    %7 = vector.broadcast %6 : bf16 to vector<1x18x4xbf16>
    %8 = arith.select %3, %5, %7 : vector<1x18x4xbf16>
    %c0_9 = arith.constant 0 : index
    %c0_10 = arith.constant 0 : index
    %c0_11 = arith.constant 0 : index
    %9 = vector.load %arg10[%c0_9, %c0_10, %c0_11] : memref<18x18x4xbf16, #tpu.memory_space<vmem>>, vector<1x18x4xbf16>
    tpu.vector_store %arg10[%c0_9, %c0_10, %c0_11], %8 {strides = array<i32>} : memref<18x18x4xbf16, #tpu.memory_space<vmem>>, vector<1x18x4xbf16>,
    %c0_i32_12 = arith.constant 0 : i32
    %10 = arith.cmpi slt, %arg1, %c0_i32_12 : i32
    %c0_13 = arith.constant 0 : index
    %c0_14 = arith.constant 0 : index
    %c0_15 = arith.constant 0 : index
    %c0_16 = arith.constant 0 : index
    %11 = vector.load %arg4[%c0_13, %c0_14, %c0_15, %c0_16] : memref<1x1x18x4xbf16, #tpu.memory_space<vmem>>, vector<1x1x18x4xbf16>
    %12 = vector.shape_cast %11 : vector<1x1x18x4xbf16> to vector<1x18x4xbf16>
    %cst_17 = arith.constant 0.000000e+00 : f32
    %13 = arith.truncf %cst_17 : f32 to bf16
    %14 = vector.broadcast %13 : bf16 to vector<1x18x4xbf16>
    %15 = arith.select %10, %12, %14 : vector<1x18x4xbf16>
    %c17 = arith.constant 17 : index
    %c0_18 = arith.constant 0 : index
    %c0_19 = arith.constant 0 : index
    %16 = vector.load %arg10[%c17, %c0_18, %c0_19] : memref<18x18x4xbf16, #tpu.memory_space<vmem>>, vector<1x18x4xbf16>
    tpu.vector_store %arg10[%c17, %c0_18, %c0_19], %15 {strides = array<i32>} : memref<18x18x4xbf16, #tpu.memory_space<vmem>>, vector<1x18x4xbf16>,
    %c0_20 = arith.constant 0 : index
    %c0_21 = arith.constant 0 : index
    %c0_22 = arith.constant 0 : index
    %17 = vector.load %arg5[%c0_20, %c0_21, %c0_22] : memref<3x3x4xf32, #tpu.memory_space<vmem>>, vector<3x3x4xf32>
    %cst_23 = arith.constant 0.000000e+00 : f32
    %18 = vector.broadcast %cst_23 : f32 to vector<16x16x4xf32>
    %c0_24 = arith.constant 0 : index
    %c0_25 = arith.constant 0 : index
    %c0_26 = arith.constant 0 : index
    %19 = vector.load %arg10[%c0_24, %c0_25, %c0_26] : memref<18x18x4xbf16, #tpu.memory_space<vmem>>, vector<18x16x4xbf16>
    %20 = arith.extf %19 : vector<18x16x4xbf16> to vector<18x16x4xf32>
    %21 = vector.extract_strided_slice %20 {offsets = [0, 0, 0], sizes = [16, 16, 4], strides = [1, 1, 1]} : vector<18x16x4xf32> to vector<16x16x4xf32>
    %22 = vector.extract_strided_slice %17 {offsets = [0, 0, 0], sizes = [1, 1, 4], strides = [1, 1, 1]} : vector<3x3x4xf32> to vector<1x1x4xf32>
    %23 = vector.shape_cast %22 : vector<1x1x4xf32> to vector<4xf32>
    %24 = vector.shape_cast %23 : vector<4xf32> to vector<1x1x4xf32>
    %25 = vector.broadcast %24 : vector<1x1x4xf32> to vector<16x16x4xf32>
    %26 = arith.mulf %21, %25 : vector<16x16x4xf32>
    %27 = arith.addf %18, %26 : vector<16x16x4xf32>
    %28 = vector.extract_strided_slice %20 {offsets = [1, 0, 0], sizes = [16, 16, 4], strides = [1, 1, 1]} : vector<18x16x4xf32> to vector<16x16x4xf32>
    %29 = vector.extract_strided_slice %17 {offsets = [1, 0, 0], sizes = [1, 1, 4], strides = [1, 1, 1]} : vector<3x3x4xf32> to vector<1x1x4xf32>
    %30 = vector.shape_cast %29 : vector<1x1x4xf32> to vector<4xf32>
    %31 = vector.shape_cast %30 : vector<4xf32> to vector<1x1x4xf32>
    %32 = vector.broadcast %31 : vector<1x1x4xf32> to vector<16x16x4xf32>
    %33 = arith.mulf %28, %32 : vector<16x16x4xf32>
    %34 = arith.addf %27, %33 : vector<16x16x4xf32>
    %35 = vector.extract_strided_slice %20 {offsets = [2, 0, 0], sizes = [16, 16, 4], strides = [1, 1, 1]} : vector<18x16x4xf32> to vector<16x16x4xf32>
    %36 = vector.extract_strided_slice %17 {offsets = [2, 0, 0], sizes = [1, 1, 4], strides = [1, 1, 1]} : vector<3x3x4xf32> to vector<1x1x4xf32>
    %37 = vector.shape_cast %36 : vector<1x1x4xf32> to vector<4xf32>
    %38 = vector.shape_cast %37 : vector<4xf32> to vector<1x1x4xf32>
    %39 = vector.broadcast %38 : vector<1x1x4xf32> to vector<16x16x4xf32>
    %40 = arith.mulf %35, %39 : vector<16x16x4xf32>
    %41 = arith.addf %34, %40 : vector<16x16x4xf32>
    %c0_27 = arith.constant 0 : index
    %c1_28 = arith.constant 1 : index
    %c0_29 = arith.constant 0 : index
    %42 = vector.load %arg10[%c0_27, %c1_28, %c0_29] : memref<18x18x4xbf16, #tpu.memory_space<vmem>>, vector<18x16x4xbf16>
    %43 = arith.extf %42 : vector<18x16x4xbf16> to vector<18x16x4xf32>
    %44 = vector.extract_strided_slice %43 {offsets = [0, 0, 0], sizes = [16, 16, 4], strides = [1, 1, 1]} : vector<18x16x4xf32> to vector<16x16x4xf32>
    %45 = vector.extract_strided_slice %17 {offsets = [0, 1, 0], sizes = [1, 1, 4], strides = [1, 1, 1]} : vector<3x3x4xf32> to vector<1x1x4xf32>
    %46 = vector.shape_cast %45 : vector<1x1x4xf32> to vector<4xf32>
    %47 = vector.shape_cast %46 : vector<4xf32> to vector<1x1x4xf32>
    %48 = vector.broadcast %47 : vector<1x1x4xf32> to vector<16x16x4xf32>
    %49 = arith.mulf %44, %48 : vector<16x16x4xf32>
    %50 = arith.addf %41, %49 : vector<16x16x4xf32>
    %51 = vector.extract_strided_slice %43 {offsets = [1, 0, 0], sizes = [16, 16, 4], strides = [1, 1, 1]} : vector<18x16x4xf32> to vector<16x16x4xf32>
    %52 = vector.extract_strided_slice %17 {offsets = [1, 1, 0], sizes = [1, 1, 4], strides = [1, 1, 1]} : vector<3x3x4xf32> to vector<1x1x4xf32>
    %53 = vector.shape_cast %52 : vector<1x1x4xf32> to vector<4xf32>
    %54 = vector.shape_cast %53 : vector<4xf32> to vector<1x1x4xf32>
    %55 = vector.broadcast %54 : vector<1x1x4xf32> to vector<16x16x4xf32>
    %56 = arith.mulf %51, %55 : vector<16x16x4xf32>
    %57 = arith.addf %50, %56 : vector<16x16x4xf32>
    %58 = vector.extract_strided_slice %43 {offsets = [2, 0, 0], sizes = [16, 16, 4], strides = [1, 1, 1]} : vector<18x16x4xf32> to vector<16x16x4xf32>
    %59 = vector.extract_strided_slice %17 {offsets = [2, 1, 0], sizes = [1, 1, 4], strides = [1, 1, 1]} : vector<3x3x4xf32> to vector<1x1x4xf32>
    %60 = vector.shape_cast %59 : vector<1x1x4xf32> to vector<4xf32>
    %61 = vector.shape_cast %60 : vector<4xf32> to vector<1x1x4xf32>
    %62 = vector.broadcast %61 : vector<1x1x4xf32> to vector<16x16x4xf32>
    %63 = arith.mulf %58, %62 : vector<16x16x4xf32>
    %64 = arith.addf %57, %63 : vector<16x16x4xf32>
    %c0_30 = arith.constant 0 : index
    %c2 = arith.constant 2 : index
    %c0_31 = arith.constant 0 : index
    %65 = vector.load %arg10[%c0_30, %c2, %c0_31] : memref<18x18x4xbf16, #tpu.memory_space<vmem>>, vector<18x16x4xbf16>
    %66 = arith.extf %65 : vector<18x16x4xbf16> to vector<18x16x4xf32>
    %67 = vector.extract_strided_slice %66 {offsets = [0, 0, 0], sizes = [16, 16, 4], strides = [1, 1, 1]} : vector<18x16x4xf32> to vector<16x16x4xf32>
    %68 = vector.extract_strided_slice %17 {offsets = [0, 2, 0], sizes = [1, 1, 4], strides = [1, 1, 1]} : vector<3x3x4xf32> to vector<1x1x4xf32>
    %69 = vector.shape_cast %68 : vector<1x1x4xf32> to vector<4xf32>
    %70 = vector.shape_cast %69 : vector<4xf32> to vector<1x1x4xf32>
    %71 = vector.broadcast %70 : vector<1x1x4xf32> to vector<16x16x4xf32>
    %72 = arith.mulf %67, %71 : vector<16x16x4xf32>
    %73 = arith.addf %64, %72 : vector<16x16x4xf32>
    %74 = vector.extract_strided_slice %66 {offsets = [1, 0, 0], sizes = [16, 16, 4], strides = [1, 1, 1]} : vector<18x16x4xf32> to vector<16x16x4xf32>
    %75 = vector.extract_strided_slice %17 {offsets = [1, 2, 0], sizes = [1, 1, 4], strides = [1, 1, 1]} : vector<3x3x4xf32> to vector<1x1x4xf32>
    %76 = vector.shape_cast %75 : vector<1x1x4xf32> to vector<4xf32>
    %77 = vector.shape_cast %76 : vector<4xf32> to vector<1x1x4xf32>
    %78 = vector.broadcast %77 : vector<1x1x4xf32> to vector<16x16x4xf32>
    %79 = arith.mulf %74, %78 : vector<16x16x4xf32>
    %80 = arith.addf %73, %79 : vector<16x16x4xf32>
    %81 = vector.extract_strided_slice %66 {offsets = [2, 0, 0], sizes = [16, 16, 4], strides = [1, 1, 1]} : vector<18x16x4xf32> to vector<16x16x4xf32>
    %82 = vector.extract_strided_slice %17 {offsets = [2, 2, 0], sizes = [1, 1, 4], strides = [1, 1, 1]} : vector<3x3x4xf32> to vector<1x1x4xf32>
    %83 = vector.shape_cast %82 : vector<1x1x4xf32> to vector<4xf32>
    %84 = vector.shape_cast %83 : vector<4xf32> to vector<1x1x4xf32>
    %85 = vector.broadcast %84 : vector<1x1x4xf32> to vector<16x16x4xf32>
    %86 = arith.mulf %81, %85 : vector<16x16x4xf32>
    %87 = arith.addf %80, %86 : vector<16x16x4xf32>
    %c0_32 = arith.constant 0 : index
    %c0_33 = arith.constant 0 : index
    %c0_34 = arith.constant 0 : index
    %88 = vector.load %arg7[%c0_32, %c0_33, %c0_34] : memref<1x1x4xf32, #tpu.memory_space<vmem>>, vector<1x1x4xf32>
    %89 = vector.shape_cast %88 : vector<1x1x4xf32> to vector<1x4xf32>
    %90 = vector.shape_cast %89 : vector<1x4xf32> to vector<1x1x4xf32>
    %91 = vector.broadcast %90 : vector<1x1x4xf32> to vector<16x16x4xf32>
    %92 = arith.addf %87, %91 : vector<16x16x4xf32>
    %cst_35 = arith.constant 0.000000e+00 : f32
    %93 = vector.broadcast %cst_35 : f32 to vector<16x16x4xf32>
    %94 = arith.maximumf %92, %93 : vector<16x16x4xf32>
    %95 = vector.shape_cast %94 : vector<16x16x4xf32> to vector<256x4xf32>
    %96 = arith.truncf %95 : vector<256x4xf32> to vector<256x4xbf16>
    %c0_36 = arith.constant 0 : index
    %c0_37 = arith.constant 0 : index
    %97 = vector.load %arg6[%c0_36, %c0_37] : memref<4x128xbf16, #tpu.memory_space<vmem>>, vector<4x128xbf16>
    %cst_38 = arith.constant dense<0.000000e+00> : vector<256x128xf32>
    %98 = tpu.matmul %96, %97, %cst_38 {dimension_numbers = #tpu.dot_dimension_numbers<[1], [0], [0], [1], [0, 0, 1, 1], [], []>} : vector<256x4xbf16>, vector<4x128xbf16>, vector<256x128xf32> -> vector<256x128xf32>
    %c0_39 = arith.constant 0 : index
    %c0_40 = arith.constant 0 : index
    %c0_41 = arith.constant 0 : index
    %99 = vector.load %arg8[%c0_39, %c0_40, %c0_41] : memref<1x1x128xf32, #tpu.memory_space<vmem>>, vector<1x1x128xf32>
    %100 = vector.shape_cast %99 : vector<1x1x128xf32> to vector<1x128xf32>
    %101 = vector.broadcast %100 : vector<1x128xf32> to vector<256x128xf32>
    %102 = arith.addf %98, %101 : vector<256x128xf32>
    %cst_42 = arith.constant 0.000000e+00 : f32
    %103 = vector.broadcast %cst_42 : f32 to vector<256x128xf32>
    %104 = arith.maximumf %102, %103 : vector<256x128xf32>
    %105 = vector.shape_cast %104 : vector<256x128xf32> to vector<1x16x16x128xf32>
    %106 = arith.truncf %105 : vector<1x16x16x128xf32> to vector<1x16x16x128xbf16>
    %c0_43 = arith.constant 0 : index
    %c0_44 = arith.constant 0 : index
    %c0_45 = arith.constant 0 : index
    %c0_46 = arith.constant 0 : index
    %107 = vector.load %arg9[%c0_43, %c0_44, %c0_45, %c0_46] : memref<1x16x16x128xbf16, #tpu.memory_space<vmem>>, vector<1x16x16x128xbf16>
    tpu.vector_store %arg9[%c0_43, %c0_44, %c0_45, %c0_46], %106 {strides = array<i32>} : memref<1x16x16x128xbf16, #tpu.memory_space<vmem>>, vector<1x16x16x128xbf16>,
    return
  }
  func.func @transform_0(%arg0: i32, %arg1: i32) -> (i32, i32, i32, i32) {
    %c0_i32 = arith.constant 0 : i32
    %c0_i32_0 = arith.constant 0 : i32
    %c0_i32_1 = arith.constant 0 : i32
    return %arg0, %arg1, %c0_i32, %c0_i32_0 : i32, i32, i32, i32
  }
  func.func @transform_1(%arg0: i32, %arg1: i32) -> (i32, i32, i32, i32) {
    %c16_i32 = arith.constant 16 : i32
    %0 = arith.muli %arg1, %c16_i32 : i32
    %c1_i32 = arith.constant 1 : i32
    %1 = arith.subi %0, %c1_i32 : i32
    %c0_i32 = arith.constant 0 : i32
    %2 = arith.maxsi %1, %c0_i32 : i32
    %c0_i32_0 = arith.constant 0 : i32
    %c0_i32_1 = arith.constant 0 : i32
    %c0_i32_2 = arith.constant 0 : i32
    return %arg0, %2, %c0_i32_0, %c0_i32_1 : i32, i32, i32, i32
  }
  func.func @transform_2(%arg0: i32, %arg1: i32) -> (i32, i32, i32, i32) {
    %c1_i32 = arith.constant 1 : i32
    %0 = arith.addi %arg1, %c1_i32 : i32
    %c16_i32 = arith.constant 16 : i32
    %1 = arith.muli %0, %c16_i32 : i32
    %c15_i32 = arith.constant 15 : i32
    %2 = arith.minsi %1, %c15_i32 : i32
    %c0_i32 = arith.constant 0 : i32
    %c0_i32_0 = arith.constant 0 : i32
    %c0_i32_1 = arith.constant 0 : i32
    return %arg0, %2, %c0_i32, %c0_i32_0 : i32, i32, i32, i32
  }
  func.func @transform_3(%arg0: i32, %arg1: i32) -> (i32, i32, i32) {
    %c0_i32 = arith.constant 0 : i32
    %c0_i32_0 = arith.constant 0 : i32
    %c0_i32_1 = arith.constant 0 : i32
    %c0_i32_2 = arith.constant 0 : i32
    return %c0_i32, %c0_i32_0, %c0_i32_1 : i32, i32, i32
  }
  func.func @transform_4(%arg0: i32, %arg1: i32) -> (i32, i32) {
    %c0_i32 = arith.constant 0 : i32
    %c0_i32_0 = arith.constant 0 : i32
    %c0_i32_1 = arith.constant 0 : i32
    return %c0_i32, %c0_i32_0 : i32, i32
  }
  func.func @transform_5(%arg0: i32, %arg1: i32) -> (i32, i32, i32) {
    %c0_i32 = arith.constant 0 : i32
    %c0_i32_0 = arith.constant 0 : i32
    %c0_i32_1 = arith.constant 0 : i32
    %c0_i32_2 = arith.constant 0 : i32
    return %c0_i32, %c0_i32_0, %c0_i32_1 : i32, i32, i32
  }
  func.func @transform_6(%arg0: i32, %arg1: i32) -> (i32, i32, i32) {
    %c0_i32 = arith.constant 0 : i32
    %c0_i32_0 = arith.constant 0 : i32
    %c0_i32_1 = arith.constant 0 : i32
    %c0_i32_2 = arith.constant 0 : i32
    return %c0_i32, %c0_i32_0, %c0_i32_1 : i32, i32, i32
  }
  func.func @transform_7(%arg0: i32, %arg1: i32) -> (i32, i32, i32, i32) {
    %c0_i32 = arith.constant 0 : i32
    %c0_i32_0 = arith.constant 0 : i32
    %c0_i32_1 = arith.constant 0 : i32
    return %arg0, %arg1, %c0_i32, %c0_i32_0 : i32, i32, i32, i32
  }
}

</mosaic_0001>

<bundles_post_ra>
// kernel: conv_dw_forward.1
= control target key start
LH: loop header
LB: loop body
LE: loop exit
PB: predicated region body
PF: predicated region fallthrough
CT: control target
= control target key end

     0   :  { %s3414_s24 = smov 0   ;;  %s3416_s1 = smov 0   ;;  %s4818_s0 = inlined_call_operand.vmem [shape: bf16[2,16,18,4], index: 0, kind: input, shape index: {}, may-alias: {0,1,2}]   ;;  %s4819_s1 = inlined_call_operand.vmem [shape: bf16[2,16,18,4], index: 1, kind: input, shape index: {}, may-alias: {0,1,2}]   ;;  %s4820_s2 = inlined_call_operand.vmem [shape: bf16[2,16,18,4], index: 2, kind: input, shape index: {}, may-alias: {0,1,2}]   ;;  %s4821_s3 = inlined_call_operand.vmem [shape: f32[3,3,4], index: 3, kind: input, shape index: {}]   ;;  %s4822_s4 = inlined_call_operand.vmem [shape: bf16[4,128], index: 4, kind: input, shape index: {}]   ;;  %s4823_s5 = inlined_call_operand.vmem [shape: f32[1,1,4], index: 5, kind: input, shape index: {}]   ;;  %s4824_s6 = inlined_call_operand.vmem [shape: f32[1,1,128], index: 6, kind: input, shape index: {}]   ;;  %s4825_s7 = inlined_call_operand.vmem [shape: bf16[2,16,16,128], index: 7, kind: output, shape index: {}]  }
   0x1   :  { %s3418_s2 = smov 0  }
   0x2 LB: > { %s29_s25 = sadd.s32 1, %s3367_s1  ;;  %p3034_p0 = scmp.ge.s32.totalorder %s3371_s2, 1  ;;  %s3371_s2 = sphi %s3418_s2, %s17_s2   ;;  %s3367_s1 = sphi %s3416_s1, %s4827_s1   ;;  %s3363_s24 = sphi %s3414_s24, %s4826_s24  }
   0x3   : > { %p31_p1 = scmp.ge.s32.totalorder %s29_s25, 2  ;;  %p323_p2 = scmp.lt.s32.totalorder %s3371_s2, 3 }
   0x5   : > { %s4829_s25 = smov (%p31_p1, %s29_s25), 0  ;;  %p324_p3 = pnand %p3034_p0, %p323_p2 }
   0x6   : > { %v2478_v0 = vld [vmem:[%s4822_s4] sm:$0x3] (!%p324_p3)  ;;  %vm2535_vm0 = vcmask (!%p324_p3), 1041408   ;;  %p392_p4 = scmp.lt.s32.totalorder (!%p324_p3), %s3363_s24, 1  ;;  %vm497_vm1 = vcmask (!%p324_p3), 27648   ;;  %vm500_vm2 = vcmask (!%p324_p3), 24576   ;;  %v649_v1 = vlaneseq (!%p324_p3) }
   0x7   : > { %327 = sbr.rel (%p324_p3) target bundleno = 576 (0x240), region = 48  ;;  %3319 = vmatprep.subr.msk.bf16.mxu0 (!%p324_p3), %vm2535_vm0, %v2478_v0  ;;  %3320 = vmatprep.subr.msk.bf16.mxu1 (!%p324_p3), %vm2535_vm0, %v2478_v0  ;;  %v2537_v2 = vsel (!%p324_p3), %vm2535_vm0, %v2478_v0, 0  ;;  %v3373_v3 = vmov (!%p324_p3), 0   ;;  %v574_v6 = vld [vmem:[%s4821_s3] sm:$0x7] (!%p324_p3)  ;;  %vm989_vm3 = vcmask (!%p324_p3), 1046528  }
   0x8   : > { %3284 = vmatpush3.bf16.msra.mxu0 (!%p324_p3), %v2537_v2  ;;  %3318 = vmatpush3.bf16.msra.mxu1 (!%p324_p3), %v2537_v2  ;;  %557 = vst.msk [vmem:[#allocation2] sm:$0xf] (!%p324_p3), %vm497_vm1, %v3373_v3  ;;  %558 = vst.msk [vmem:[#allocation2 + $0x4] sm:$0xf] (!%p324_p3), %vm497_vm1, %v3373_v3  ;;  %v650_v4 = vshrl.u32 (!%p324_p3), %v649_v1, 7  ;;  %vm1758_vm4 = vcmask (!%p324_p3), 1045504  }
   0x9   : > { %559 = vst.msk [vmem:[#allocation2 + $0x8] sm:$0x1] (!%p324_p3), %vm500_vm2, %v3373_v3  ;;  %573 = vst.msk [vmem:[#allocation2 + $0xd4] sm:$0x1] (!%p324_p3), %vm500_vm2, %v3373_v3  ;;  %v575_v7 = vld [vmem:[%s4821_s3 + $0x4] sm:$0x7] (!%p324_p3) }
   0xa   : > { %571 = vst.msk [vmem:[#allocation2 + $0xcc] sm:$0xf] (!%p324_p3), %vm497_vm1, %v3373_v3  ;;  %572 = vst.msk [vmem:[#allocation2 + $0xd0] sm:$0xf] (!%p324_p3), %vm497_vm1, %v3373_v3  ;;  %v891_v5 = vsub.s32 (!%p324_p3), 1, %v650_v4  ;;  %v651_v8 = vsub.s32 (!%p324_p3), 0, %v650_v4 }
   0xb   : > { %v1660_v9 = vsub.s32 (!%p324_p3), 2, %v650_v4  ;;  %v576_v13 = vld [vmem:[%s4821_s3 + $0x8] sm:$0x7] (!%p324_p3)  ;;  %vm2486_vm5 = vcmask (!%p324_p3), 31744  }
   0xc   : > { %v3467_v17 = vrot.slane (!%p324_p3), %v574_v6, %v891_v5  ;;  %v3472_v23 = vrot.slane (!%p324_p3), %v574_v6, %v651_v8  ;;  %v3477_v28 = vrot.slane (!%p324_p3), %v575_v7, %v651_v8  ;;  %v3487_v34 = vrot.slane (!%p324_p3), %v576_v13, %v651_v8 }
   0xd   : > { %v3479_v30 = vrot.slane (!%p324_p3), %v574_v6, %v1660_v9  ;;  %v3491_v37 = vrot.slane (!%p324_p3), %v575_v7, %v891_v5  ;;  %v3500_v42 = vrot.slane (!%p324_p3), %v576_v13, %v891_v5  ;;  %v3502_v43 = vrot.slane (!%p324_p3), %v575_v7, %v1660_v9 }
   0xe   : > { %s4831_s24 = smov (!%p392_p4, %s3363_s24), 1  ;;  %v3504_v44 = vrot.slane %v576_v13, %v1660_v9 }
   0xf   : > { %s3321_s28 = smul.u32 192, %s4831_s24  ;;  %v3128_v18 = vld [vmem:[#allocation2] sm:$0xff]   ;;  %s3094_s23 = sshll.u32 %s4831_s24, 7 }
  0x10   : > { %v853_v19 = vld [vmem:[#allocation2 + $0x8] sm:$0x1]  ;;  %v1622_v20 = vld [vmem:[#allocation2] sm:$0xe]  ;;  %v3129_v21 = vunpack.c.l.bf16 %v3128_v18  ;;  %v3130_v22 = vunpack.c.h.bf16 %v3128_v18  ;;  %s4765_s27 = scalar_lea.vmem %s4825_s7, %s3094_s23 }
  0x11   : > { %s3450_s10 = scalar_lea.vmem %s4818_s0, %s3321_s28  ;;  %v871_v24 = vunpack.c.l.bf16 %v853_v19  ;;  %v1640_v29 = vunpack.c.l.bf16 %v1622_v20 }
  0x12   : > { %v448_v10 = vld [vmem:[%s3450_s10] sm:$0xf]  ;;  %v449_v11 = vld [vmem:[%s3450_s10 + $0x4] sm:$0xf]  ;;  %v450_v12 = vld [vmem:[%s3450_s10 + $0x8] sm:$0x1]  ;;  %v893_v35 = vmul.f32 %v3129_v21, %v3467_v17  ;;  %v894_v36 = vmul.f32 %v3130_v22, %v3467_v17  ;;  %v653_v48 = vmul.f32 %v3129_v21, %v3472_v23  ;;  %v654_v49 = vmul.f32 %v3130_v22, %v3472_v23 }
  0x13   : > { %v451_v14 = vld [vmem:[%s3450_s10 + $0xc] sm:$0xf]  ;;  %v452_v15 = vld [vmem:[%s3450_s10 + $0x10] sm:$0xf]  ;;  %v453_v16 = vld [vmem:[%s3450_s10 + $0x14] sm:$0x1]  ;;  %v895_v41 = vmul.f32 %v3467_v17, %v871_v24  ;;  %v3520_v57 = vmul.f32 %v3479_v30, %v1640_v29  ;;  %v3523_v58 = vmul.f32 %v3130_v22, %v3479_v30  ;;  %v3526_v59 = vmul.f32 %v3479_v30, %v871_v24 }
  0x14   : > { %498 = vst.msk [vmem:[#allocation2 + $0xc] sm:$0xf] %vm497_vm1, %v448_v10  ;;  %499 = vst.msk [vmem:[#allocation2 + $0x10] sm:$0xf] %vm497_vm1, %v449_v11  ;;  %v469_v25 = vld [vmem:[%s3450_s10 + $0x54] sm:$0xf] }
  0x15   : > { %501 = vst.msk [vmem:[#allocation2 + $0x14] sm:$0x1] %vm500_vm2, %v450_v12  ;;  %504 = vst.msk [vmem:[#allocation2 + $0x20] sm:$0x1] %vm500_vm2, %v453_v16  ;;  %v470_v26 = vld [vmem:[%s3450_s10 + $0x58] sm:$0xf] }
  0x16   : > { %502 = vst.msk [vmem:[#allocation2 + $0x18] sm:$0xf] %vm497_vm1, %v451_v14  ;;  %503 = vst.msk [vmem:[#allocation2 + $0x1c] sm:$0xf] %vm497_vm1, %v452_v15  ;;  %v471_v27 = vld [vmem:[%s3450_s10 + $0x5c] sm:$0x1] }
  0x17   : > { %v472_v31 = vld [vmem:[%s3450_s10 + $0x60] sm:$0xf]  ;;  %v473_v32 = vld [vmem:[%s3450_s10 + $0x64] sm:$0xf]  ;;  %v474_v33 = vld [vmem:[%s3450_s10 + $0x68] sm:$0x1] }
  0x18   : > { %520 = vst.msk [vmem:[#allocation2 + $0x60] sm:$0xf] %vm497_vm1, %v469_v25  ;;  %521 = vst.msk [vmem:[#allocation2 + $0x64] sm:$0xf] %vm497_vm1, %v470_v26  ;;  %v475_v38 = vld [vmem:[%s3450_s10 + $0x6c] sm:$0xf] }
  0x19   : > { %522 = vst.msk [vmem:[#allocation2 + $0x68] sm:$0x1] %vm500_vm2, %v471_v27  ;;  %v476_v39 = vld [vmem:[%s3450_s10 + $0x70] sm:$0xf]  ;;  %v477_v40 = vld [vmem:[%s3450_s10 + $0x74] sm:$0x1] }
  0x1a   : > { %523 = vst.msk [vmem:[#allocation2 + $0x6c] sm:$0xf] %vm497_vm1, %v472_v31  ;;  %524 = vst.msk [vmem:[#allocation2 + $0x70] sm:$0xf] %vm497_vm1, %v473_v32  ;;  %v454_v45 = vld [vmem:[%s3450_s10 + $0x18] sm:$0xf] }
  0x1b   : > { %525 = vst.msk [vmem:[#allocation2 + $0x74] sm:$0x1] %vm500_vm2, %v474_v33  ;;  %528 = vst.msk [vmem:[#allocation2 + $0x80] sm:$0x1] %vm500_vm2, %v477_v40  ;;  %v455_v46 = vld [vmem:[%s3450_s10 + $0x1c] sm:$0xf] }
  0x1c   : > { %526 = vst.msk [vmem:[#allocation2 + $0x78] sm:$0xf] %vm497_vm1, %v475_v38  ;;  %527 = vst.msk [vmem:[#allocation2 + $0x7c] sm:$0xf] %vm497_vm1, %v476_v39  ;;  %v456_v47 = vld [vmem:[%s3450_s10 + $0x20] sm:$0x1] }
  0x1d   : > { %v990_v50 = vrot.slane %v893_v35, 1  ;;  %v991_v51 = vrot.slane %v894_v36, 1  ;;  %505 = vst.msk [vmem:[#allocation2 + $0x24] sm:$0xf] %vm497_vm1, %v454_v45  ;;  %506 = vst.msk [vmem:[#allocation2 + $0x28] sm:$0xf] %vm497_vm1, %v455_v46 }
  0x1e   : > { %507 = vst.msk [vmem:[#allocation2 + $0x2c] sm:$0x1] %vm500_vm2, %v456_v47  ;;  %v478_v52 = vld [vmem:[%s3450_s10 + $0x78] sm:$0xf]  ;;  %v479_v53 = vld [vmem:[%s3450_s10 + $0x7c] sm:$0xf] }
  0x1f   : > { %v579_v54 = vld [vmem:[#allocation2 + $0xc] sm:$0xff]   ;;  %v854_v55 = vld [vmem:[#allocation2 + $0x14] sm:$0x1]  ;;  %v993_v56 = vrot.slane %v895_v41, 1  ;;  %529 = vst.msk [vmem:[#allocation2 + $0x84] sm:$0xf] %vm497_vm1, %v478_v52  ;;  %v992_v1 = vsel %vm989_vm3, %v990_v50, %v991_v51 }
  0x20   : > { %530 = vst.msk [vmem:[#allocation2 + $0x88] sm:$0xf] %vm497_vm1, %v479_v53  ;;  %v3243_v60 = vld [vmem:[#allocation2 + $0x18] sm:$0xff]   ;;  %v3530_v61 = vunpack.c.l.bf16 %v579_v54  ;;  %v3532_v62 = vunpack.c.h.bf16 %v579_v54  ;;  %v855_v63 = vld [vmem:[#allocation2 + $0x20] sm:$0x1]  ;;  %v3534_v0 = vunpack.c.l.bf16 %v854_v55  ;;  %v1760_v54 = vrot.slane %v3523_v58, 2 }
  0x21   : > { %v3537_v2 = vunpack.c.l.bf16 %v3243_v60  ;;  %v3539_v3 = vunpack.c.h.bf16 %v3243_v60  ;;  %v3541_v4 = vunpack.c.l.bf16 %v855_v63  ;;  %v994_v5 = vsel %vm989_vm3, %v991_v51, %v993_v56  ;;  %v480_v6 = vld [vmem:[%s3450_s10 + $0x80] sm:$0x1]  ;;  %v457_v7 = vld [vmem:[%s3450_s10 + $0x24] sm:$0xf]  ;;  %v458_v8 = vld [vmem:[%s3450_s10 + $0x28] sm:$0xf] }
  0x22   : > { %v721_v9 = vmul.f32 %v3477_v28, %v3530_v61  ;;  %v722_v10 = vmul.f32 %v3477_v28, %v3532_v62  ;;  %v1138_v11 = vmul.f32 %v3491_v37, %v3530_v61  ;;  %v1139_v12 = vmul.f32 %v3491_v37, %v3532_v62  ;;  %531 = vst.msk [vmem:[#allocation2 + $0x8c] sm:$0x1] %vm500_vm2, %v480_v6  ;;  %v1623_v18 = vld [vmem:[#allocation2 + $0xc] sm:$0xe]  ;;  %v1624_v24 = vld [vmem:[#allocation2 + $0x18] sm:$0xe] }
  0x23   : > { %508 = vst.msk [vmem:[#allocation2 + $0x30] sm:$0xf] %vm497_vm1, %v457_v7  ;;  %509 = vst.msk [vmem:[#allocation2 + $0x34] sm:$0xf] %vm497_vm1, %v458_v8  ;;  %v789_v13 = vmul.f32 %v3537_v2, %v3487_v34  ;;  %v790_v14 = vmul.f32 %v3539_v3, %v3487_v34  ;;  %v1140_v15 = vmul.f32 %v3491_v37, %v3534_v0  ;;  %v1641_v35 = vunpack.c.l.bf16 %v1623_v18  ;;  %v459_v41 = vld [vmem:[%s3450_s10 + $0x2c] sm:$0x1] }
  0x24   : > { %v1382_v16 = vmul.f32 %v3537_v2, %v3500_v42  ;;  %v753_v19 = vadd.f32 %v721_v9, %v653_v48  ;;  %v754_v20 = vadd.f32 %v722_v10, %v654_v49  ;;  %v1234_v21 = vrot.slane %v1138_v11, 1  ;;  %510 = vst.msk [vmem:[#allocation2 + $0x38] sm:$0x1] %vm500_vm2, %v459_v41  ;;  %v481_v49 = vld [vmem:[%s3450_s10 + $0x84] sm:$0xf] }
  0x25   : > { %v1235_v22 = vrot.slane %v1139_v12, 1  ;;  %v1237_v25 = vrot.slane %v1140_v15, 1  ;;  %v1383_v26 = vmul.f32 %v3539_v3, %v3500_v42  ;;  %v1384_v27 = vmul.f32 %v3500_v42, %v3541_v4  ;;  %v482_v50 = vld [vmem:[%s3450_s10 + $0x88] sm:$0xf]  ;;  %532 = vst.msk [vmem:[#allocation2 + $0x90] sm:$0xf] %vm497_vm1, %v481_v49 }
  0x26   : > { %v1478_v29 = vrot.slane %v1382_v16, 1  ;;  %v821_v31 = vadd.f32 %v789_v13, %v753_v19  ;;  %v822_v32 = vadd.f32 %v790_v14, %v754_v20  ;;  %v3572_v40 = vunpack.c.l.bf16 %v1624_v24  ;;  %533 = vst.msk [vmem:[#allocation2 + $0x94] sm:$0xf] %vm497_vm1, %v482_v50  ;;  %v3246_v63 = vld [vmem:[#allocation2 + $0x60] sm:$0xff]   ;;  %v462_v9 = vld [vmem:[%s3450_s10 + $0x38] sm:$0x1] }
  0x27   : > { %v1236_v33 = vsel %vm989_vm3, %v1234_v21, %v1235_v22  ;;  %v1238_v36 = vsel %vm989_vm3, %v1235_v22, %v1237_v25  ;;  %v1479_v38 = vrot.slane %v1383_v26, 1  ;;  %v1481_v39 = vrot.slane %v1384_v27, 1  ;;  %v484_v10 = vld [vmem:[%s3450_s10 + $0x90] sm:$0xf]  ;;  %513 = vst.msk [vmem:[#allocation2 + $0x44] sm:$0x1] %vm500_vm2, %v462_v9 }
  0x28   : > { %v1102_v45 = vadd.f32 %v992_v1, %v821_v31  ;;  %v1103_v46 = vadd.f32 %v994_v5, %v822_v32  ;;  %v3576_v47 = vmul.f32 %v3479_v30, %v1641_v35  ;;  %v1759_v48 = vrot.slane %v3520_v57, 2  ;;  %v483_v1 = vld [vmem:[%s3450_s10 + $0x8c] sm:$0x1]  ;;  %v460_v5 = vld [vmem:[%s3450_s10 + $0x30] sm:$0xf]  ;;  %v3247_v32 = vld [vmem:[#allocation2 + $0x78] sm:$0xff]  }
  0x29   : > { %v1480_v51 = vsel %vm989_vm3, %v1478_v29, %v1479_v38  ;;  %v1482_v52 = vsel %vm989_vm3, %v1479_v38, %v1481_v39  ;;  %v3586_v53 = vmul.f32 %v3479_v30, %v3572_v40  ;;  %v1762_v57 = vrot.slane %v3526_v59, 2  ;;  %534 = vst.msk [vmem:[#allocation2 + $0x98] sm:$0x1] %vm500_vm2, %v483_v1  ;;  %v461_v59 = vld [vmem:[%s3450_s10 + $0x34] sm:$0xf]  ;;  %v595_v31 = vld [vmem:[#allocation2 + $0x6c] sm:$0xff]  }
  0x2a   : > { %v1346_v55 = vadd.f32 %v1236_v33, %v1102_v45  ;;  %v1347_v56 = vadd.f32 %v1238_v36, %v1103_v46  ;;  %v1764_v60 = vrot.slane %v3576_v47, 2  ;;  %v1761_v6 = vsel %vm1758_vm4, %v1759_v48, %v1760_v54  ;;  %511 = vst.msk [vmem:[#allocation2 + $0x3c] sm:$0xf] %vm497_vm1, %v460_v5  ;;  %512 = vst.msk [vmem:[#allocation2 + $0x40] sm:$0xf] %vm497_vm1, %v461_v59 }
  0x2b   : > { %v1907_v58 = vmul.f32 %v3502_v43, %v1641_v35  ;;  %v1908_v7 = vmul.f32 %v3502_v43, %v3532_v62  ;;  %v1909_v8 = vmul.f32 %v3502_v43, %v3534_v0  ;;  %v1763_v13 = vsel %vm1758_vm4, %v1760_v54, %v1762_v57  ;;  %v485_v15 = vld [vmem:[%s3450_s10 + $0x94] sm:$0xf]  ;;  %v486_v16 = vld [vmem:[%s3450_s10 + $0x98] sm:$0x1]  ;;  %535 = vst.msk [vmem:[#allocation2 + $0x9c] sm:$0xf] %vm497_vm1, %v484_v10 }
  0x2c   : > { %v1590_v11 = vadd.f32 %v1480_v51, %v1346_v55  ;;  %v1591_v12 = vadd.f32 %v1482_v52, %v1347_v56  ;;  %v2151_v14 = vmul.f32 %v3504_v44, %v3572_v40  ;;  %v463_v18 = vld [vmem:[%s3450_s10 + $0x3c] sm:$0xf]  ;;  %v2152_v22 = vmul.f32 %v3539_v3, %v3504_v44  ;;  %536 = vst.msk [vmem:[#allocation2 + $0xa0] sm:$0xf] %vm497_vm1, %v485_v15  ;;  %v464_v24 = vld [vmem:[%s3450_s10 + $0x40] sm:$0xf] }
  0x2d   : > { %v2003_v19 = vrot.slane %v1907_v58, 2  ;;  %v2004_v20 = vrot.slane %v1908_v7, 2  ;;  %v2006_v21 = vrot.slane %v1909_v8, 2  ;;  %537 = vst.msk [vmem:[#allocation2 + $0xa4] sm:$0x1] %vm500_vm2, %v486_v16  ;;  %v2153_v27 = vmul.f32 %v3504_v44, %v3541_v4 }
  0x2e   : > { %514 = vst.msk [vmem:[#allocation2 + $0x48] sm:$0xf] %vm497_vm1, %v463_v18  ;;  %v1871_v25 = vadd.f32 %v1761_v6, %v1590_v11  ;;  %v1872_v26 = vadd.f32 %v1763_v13, %v1591_v12  ;;  %v2247_v29 = vrot.slane %v2151_v14, 2  ;;  %v465_v33 = vld [vmem:[%s3450_s10 + $0x44] sm:$0x1]  ;;  %v2248_v38 = vrot.slane %v2152_v22, 2 }
  0x2f   : > { %515 = vst.msk [vmem:[#allocation2 + $0x4c] sm:$0xf] %vm497_vm1, %v464_v24  ;;  %v2005_v35 = vsel %vm1758_vm4, %v2003_v19, %v2004_v20  ;;  %v2007_v36 = vsel %vm1758_vm4, %v2004_v20, %v2006_v21  ;;  %v3627_v39 = vunpack.c.l.bf16 %v3246_v63  ;;  %v2250_v46 = vrot.slane %v2153_v27, 2  ;;  %v3636_v50 = vld [vmem:[%s4823_s5] ss:$0 sm:$0xff] }
  0x30   : > { %516 = vst.msk [vmem:[#allocation2 + $0x50] sm:$0x1] %vm500_vm2, %v465_v33  ;;  %v2115_v41 = vadd.f32 %v2005_v35, %v1871_v25  ;;  %v2116_v45 = vadd.f32 %v2007_v36, %v1872_v26  ;;  %v3630_v48 = vunpack.c.h.bf16 %v3246_v63  ;;  %v2249_v49 = vsel %vm1758_vm4, %v2247_v29, %v2248_v38  ;;  %v861_v55 = vld [vmem:[#allocation2 + $0x68] sm:$0x1]  ;;  %v862_v5 = vld [vmem:[#allocation2 + $0x74] sm:$0x1] }
  0x31   : > { %v3638_v51 = vunpack.c.l.bf16 %v3247_v32  ;;  %v3640_v52 = vunpack.c.h.bf16 %v3247_v32  ;;  %v3642_v54 = vunpack.c.l.bf16 %v595_v31  ;;  %v2251_v56 = vsel %vm1758_vm4, %v2248_v38, %v2250_v46  ;;  %v863_v6 = vld [vmem:[#allocation2 + $0x80] sm:$0x1]  ;;  %v487_v33 = vld [vmem:[%s3450_s10 + $0x9c] sm:$0xf] }
  0x32   : > { %v2359_v57 = vadd.f32 %v2249_v49, %v2115_v41  ;;  %v3645_v1 = vunpack.c.h.bf16 %v595_v31  ;;  %v669_v63 = vmul.f32 %v3627_v39, %v3472_v23  ;;  %v2360_v58 = vadd.f32 %v2251_v56, %v2116_v45  ;;  %v488_v35 = vld [vmem:[%s3450_s10 + $0xa0] sm:$0xf]  ;;  %538 = vst.msk [vmem:[#allocation2 + $0xa8] sm:$0xf] %vm497_vm1, %v487_v33 }
  0x33   : > { %v670_v7 = vmul.f32 %v3630_v48, %v3472_v23  ;;  %v737_v8 = vmul.f32 %v3477_v28, %v3642_v54  ;;  %v805_v59 = vmul.f32 %v3638_v51, %v3487_v34  ;;  %v806_v11 = vmul.f32 %v3640_v52, %v3487_v34  ;;  %539 = vst.msk [vmem:[#allocation2 + $0xac] sm:$0xf] %vm497_vm1, %v488_v35 }
  0x34   : > { %v2398_v9 = vadd.f32 %v3636_v50, %v2359_v57  ;;  %v738_v10 = vmul.f32 %v3477_v28, %v3645_v1  ;;  %v3660_v12 = vunpack.c.l.bf16 %v861_v55  ;;  %v2399_v13 = vadd.f32 %v3636_v50, %v2360_v58  ;;  %v1630_v57 = vld [vmem:[#allocation2 + $0x60] sm:$0xe] }
  0x35   : > { %v769_v14 = vadd.f32 %v737_v8, %v669_v63  ;;  %v3663_v15 = vunpack.c.l.bf16 %v862_v5  ;;  %v3665_v16 = vunpack.c.l.bf16 %v863_v6  ;;  %v917_v20 = vmul.f32 %v3627_v39, %v3467_v17  ;;  %v1631_v63 = vld [vmem:[#allocation2 + $0x6c] sm:$0xe]  ;;  %v1632_v8 = vld [vmem:[#allocation2 + $0x78] sm:$0xe] }
  0x36   : > { %v2430_v18 = vmax.f32 %v2398_v9, 0.0  ;;  %v770_v19 = vadd.f32 %v738_v10, %v670_v7  ;;  %v918_v21 = vmul.f32 %v3630_v48, %v3467_v17  ;;  %v2431_v22 = vmax.f32 %v2399_v13, 0.0 }
  0x37   : > { %v837_v24 = vadd.f32 %v805_v59, %v769_v14  ;;  %v919_v25 = vmul.f32 %v3467_v17, %v3660_v12  ;;  %v1162_v26 = vmul.f32 %v3491_v37, %v3642_v54  ;;  %v1030_v29 = vrot.slane %v917_v20, 1  ;;  %v489_v59 = vld [vmem:[%s3450_s10 + $0xa4] sm:$0x1] }
  0x38   : > { %v838_v27 = vadd.f32 %v806_v11, %v770_v19  ;;  %v1031_v31 = vrot.slane %v918_v21, 1  ;;  %v1163_v32 = vmul.f32 %v3491_v37, %v3645_v1  ;;  %v2462_v36 = vpack.c.bf16 %v2431_v22, %v2430_v18  ;;  %540 = vst.msk [vmem:[#allocation2 + $0xb0] sm:$0x1] %vm500_vm2, %v489_v59 }
  0x39   : > { %v1033_v38 = vrot.slane %v919_v25, 1  ;;  %v1164_v41 = vmul.f32 %v3491_v37, %v3663_v15  ;;  %v1274_v45 = vrot.slane %v1162_v26, 1  ;;  %v1406_v55 = vmul.f32 %v3638_v51, %v3500_v42 }
  0x3a   : > { %v1032_v46 = vsel %vm989_vm3, %v1030_v29, %v1031_v31  ;;  %v1275_v49 = vrot.slane %v1163_v32, 1  ;;  %v1407_v56 = vmul.f32 %v3640_v52, %v3500_v42  ;;  %3285 = vmatprep.mubr.msk.bf16.mxu0 %vm2486_vm5, %v2462_v36  ;;  %v1408_v7 = vmul.f32 %v3500_v42, %v3665_v16 }
  0x3b   : > { %v1034_v5 = vsel %vm989_vm3, %v1031_v31, %v1033_v38  ;;  %v1118_v6 = vadd.f32 %v1032_v46, %v837_v24  ;;  %v1277_v58 = vrot.slane %v1164_v41, 1  ;;  %v1518_v11 = vrot.slane %v1406_v55, 1 }
  0x3c   : > { %v1119_v9 = vadd.f32 %v1034_v5, %v838_v27  ;;  %v1276_v10 = vsel %vm989_vm3, %v1274_v45, %v1275_v49  ;;  %v1519_v13 = vrot.slane %v1407_v56, 1  ;;  %v1521_v19 = vrot.slane %v1408_v7, 1  ;;  %v583_v7 = vld [vmem:[#allocation2 + $0x24] sm:$0xff]  }
  0x3d   : > { %v1278_v14 = vsel %vm989_vm3, %v1275_v49, %v1277_v58  ;;  %v1362_v18 = vadd.f32 %v1276_v10, %v1118_v6  ;;  %v3696_v20 = vunpack.c.l.bf16 %v1630_v57  ;;  %v3699_v24 = vunpack.c.l.bf16 %v1631_v63 }
  0x3e   : > { %v1363_v21 = vadd.f32 %v1278_v14, %v1119_v9  ;;  %v1520_v22 = vsel %vm989_vm3, %v1518_v11, %v1519_v13  ;;  %v3701_v25 = vunpack.c.l.bf16 %v1632_v8  ;;  %v1522_v26 = vsel %vm989_vm3, %v1519_v13, %v1521_v19 }
  0x3f   : > { %v1606_v27 = vadd.f32 %v1520_v22, %v1362_v18  ;;  %v1686_v29 = vmul.f32 %v3479_v30, %v3696_v20  ;;  %v1687_v31 = vmul.f32 %v3630_v48, %v3479_v30  ;;  %v1688_v33 = vmul.f32 %v3479_v30, %v3660_v12 }
  0x40   : > { %v1607_v32 = vadd.f32 %v1522_v26, %v1363_v21  ;;  %v3712_v35 = vmul.f32 %v3479_v30, %v3701_v25  ;;  %v1931_v36 = vmul.f32 %v3502_v43, %v3699_v24  ;;  %v1932_v45 = vmul.f32 %v3502_v43, %v3645_v1 }
  0x41   : > { %v1799_v38 = vrot.slane %v1686_v29, 2  ;;  %v1800_v41 = vrot.slane %v1687_v31, 2  ;;  %v1933_v46 = vmul.f32 %v3502_v43, %v3663_v15  ;;  %v1802_v49 = vrot.slane %v1688_v33, 2  ;;  %v856_v29 = vld [vmem:[#allocation2 + $0x2c] sm:$0x1] }
  0x42   : > { %v2043_v55 = vrot.slane %v1931_v36, 2  ;;  %v2175_v56 = vmul.f32 %v3504_v44, %v3701_v25  ;;  %v2176_v57 = vmul.f32 %v3640_v52, %v3504_v44  ;;  %v2044_v5 = vrot.slane %v1932_v45, 2 }
  0x43   : > { %v1801_v63 = vsel %vm1758_vm4, %v1799_v38, %v1800_v41  ;;  %v2046_v6 = vrot.slane %v1933_v46, 2  ;;  %v2177_v58 = vmul.f32 %v3504_v44, %v3665_v16  ;;  %v1803_v8 = vsel %vm1758_vm4, %v1800_v41, %v1802_v49 }
  0x44   : > { %v1887_v59 = vadd.f32 %v1801_v63, %v1606_v27  ;;  %v2287_v9 = vrot.slane %v2175_v56, 2  ;;  %v2288_v10 = vrot.slane %v2176_v57, 2  ;;  %v1888_v11 = vadd.f32 %v1803_v8, %v1607_v32 }
  0x45   : > { %v2045_v13 = vsel %vm1758_vm4, %v2043_v55, %v2044_v5  ;;  %v2047_v14 = vsel %vm1758_vm4, %v2044_v5, %v2046_v6  ;;  %v2290_v18 = vrot.slane %v2177_v58, 2  ;;  %v3731_v22 = vunpack.c.l.bf16 %v583_v7 }
  0x46   : > { %v2131_v19 = vadd.f32 %v2045_v13, %v1887_v59  ;;  %v2289_v21 = vsel %vm1758_vm4, %v2287_v9, %v2288_v10  ;;  %v3733_v26 = vunpack.c.h.bf16 %v583_v7  ;;  %v2132_v31 = vadd.f32 %v2047_v14, %v1888_v11 }
  0x47   : > { %v2291_v33 = vsel %vm1758_vm4, %v2288_v10, %v2290_v18  ;;  %v655_v27 = vmul.f32 %v3472_v23, %v3530_v61  ;;  %v656_v32 = vmul.f32 %v3472_v23, %v3532_v62  ;;  %v723_v38 = vmul.f32 %v3537_v2, %v3477_v28 }
  0x48   : > { %v2375_v36 = vadd.f32 %v2289_v21, %v2131_v19  ;;  %v724_v41 = vmul.f32 %v3539_v3, %v3477_v28  ;;  %v791_v45 = vmul.f32 %v3487_v34, %v3731_v22  ;;  %v2376_v46 = vadd.f32 %v2291_v33, %v2132_v31  ;;  %v1625_v21 = vld [vmem:[#allocation2 + $0x24] sm:$0xe] }
  0x49   : > { %v792_v49 = vmul.f32 %v3487_v34, %v3733_v26  ;;  %v3748_v55 = vunpack.c.l.bf16 %v856_v29  ;;  %v896_v56 = vmul.f32 %v3467_v17, %v3530_v61  ;;  %v755_v63 = vadd.f32 %v723_v38, %v655_v27 }
  0x4a   : > { %v2414_v57 = vadd.f32 %v3636_v50, %v2375_v36  ;;  %v756_v5 = vadd.f32 %v724_v41, %v656_v32  ;;  %v897_v6 = vmul.f32 %v3467_v17, %v3532_v62  ;;  %v2415_v58 = vadd.f32 %v3636_v50, %v2376_v46  ;;  %v466_v32 = vld [vmem:[%s3450_s10 + $0x48] sm:$0xf]  ;;  %v467_v36 = vld [vmem:[%s3450_s10 + $0x4c] sm:$0xf] }
  0x4b   : > { %v898_v7 = vmul.f32 %v3467_v17, %v3534_v0  ;;  %v995_v8 = vrot.slane %v896_v56, 1  ;;  %v1141_v59 = vmul.f32 %v3537_v2, %v3491_v37  ;;  %v823_v61 = vadd.f32 %v791_v45, %v755_v63  ;;  %517 = vst.msk [vmem:[#allocation2 + $0x54] sm:$0xf] %vm497_vm1, %v466_v32  ;;  %518 = vst.msk [vmem:[#allocation2 + $0x58] sm:$0xf] %vm497_vm1, %v467_v36  ;;  %v599_v32 = vld [vmem:[#allocation2 + $0x84] sm:$0xff]  }
  0x4c   : > { %v2446_v9 = vmax.f32 %v2414_v57, 0.0  ;;  %v824_v10 = vadd.f32 %v792_v49, %v756_v5  ;;  %v996_v11 = vrot.slane %v897_v6, 1  ;;  %v2447_v13 = vmax.f32 %v2415_v58, 0.0 }
  0x4d   : > { %v998_v14 = vrot.slane %v898_v7, 1  ;;  %v1142_v18 = vmul.f32 %v3539_v3, %v3491_v37  ;;  %v1143_v19 = vmul.f32 %v3491_v37, %v3541_v4  ;;  %v1239_v31 = vrot.slane %v1141_v59, 1 }
  0x4e   : > { %v997_v29 = vsel %vm989_vm3, %v995_v8, %v996_v11  ;;  %v1385_v33 = vmul.f32 %v3500_v42, %v3731_v22  ;;  %v1386_v27 = vmul.f32 %v3500_v42, %v3733_v26  ;;  %v2470_v38 = vpack.c.bf16 %v2447_v13, %v2446_v9  ;;  %v468_v8 = vld [vmem:[%s3450_s10 + $0x50] sm:$0x1] }
  0x4f   : > { %v999_v41 = vsel %vm989_vm3, %v996_v11, %v998_v14  ;;  %v1104_v45 = vadd.f32 %v997_v29, %v823_v61  ;;  %v1240_v46 = vrot.slane %v1142_v18, 1  ;;  %v1242_v56 = vrot.slane %v1143_v19, 1  ;;  %519 = vst.msk [vmem:[#allocation2 + $0x5c] sm:$0x1] %vm500_vm2, %v468_v8 }
  0x50   : > { %v1105_v49 = vadd.f32 %v999_v41, %v824_v10  ;;  %v1387_v57 = vmul.f32 %v3500_v42, %v3748_v55  ;;  %v1483_v63 = vrot.slane %v1385_v33, 1  ;;  %3301 = vmatprep.mubr.msk.bf16.mxu1 %vm2486_vm5, %v2470_v38  ;;  %v1484_v6 = vrot.slane %v1386_v27, 1 }
  0x51   : > { %v1241_v5 = vsel %vm989_vm3, %v1239_v31, %v1240_v46  ;;  %v3778_v58 = vunpack.c.l.bf16 %v1625_v21  ;;  %v1666_v7 = vmul.f32 %v3479_v30, %v3532_v62  ;;  %v1243_v59 = vsel %vm989_vm3, %v1240_v46, %v1242_v56 }
  0x52   : > { %v1348_v9 = vadd.f32 %v1241_v5, %v1104_v45  ;;  %v1486_v61 = vrot.slane %v1387_v57, 1  ;;  %v1667_v10 = vmul.f32 %v3479_v30, %v3534_v0  ;;  %v1349_v11 = vadd.f32 %v1243_v59, %v1105_v49 }
  0x53   : > { %v1485_v13 = vsel %vm989_vm3, %v1483_v63, %v1484_v6  ;;  %v1765_v14 = vrot.slane %v1666_v7, 2  ;;  %v1910_v18 = vmul.f32 %v3502_v43, %v3572_v40  ;;  %v1911_v29 = vmul.f32 %v3539_v3, %v3502_v43 }
  0x54   : > { %v1487_v19 = vsel %vm989_vm3, %v1484_v6, %v1486_v61  ;;  %v1592_v62 = vadd.f32 %v1485_v13, %v1348_v9  ;;  %v1767_v21 = vrot.slane %v1667_v10, 2  ;;  %v1912_v33 = vmul.f32 %v3502_v43, %v3541_v4 }
  0x55   : > { %v1593_v31 = vadd.f32 %v1487_v19, %v1349_v11  ;;  %v1766_v0 = vsel %vm1758_vm4, %v1764_v60, %v1765_v14  ;;  %v2008_v27 = vrot.slane %v1910_v18, 2  ;;  %v2009_v38 = vrot.slane %v1911_v29, 2  ;;  %v864_v11 = vld [vmem:[#allocation2 + $0x8c] sm:$0x1] }
  0x56   : > { %v1768_v36 = vsel %vm1758_vm4, %v1765_v14, %v1767_v21  ;;  %v1873_v40 = vadd.f32 %v1766_v0, %v1592_v62  ;;  %v2154_v41 = vmul.f32 %v3504_v44, %v3778_v58  ;;  %v2011_v46 = vrot.slane %v1912_v33, 2 }
  0x57   : > { %v1874_v45 = vadd.f32 %v1768_v36, %v1593_v31  ;;  %v2155_v49 = vmul.f32 %v3504_v44, %v3733_v26  ;;  %v2156_v47 = vmul.f32 %v3504_v44, %v3748_v55  ;;  %v2010_v60 = vsel %vm1758_vm4, %v2008_v27, %v2009_v38 }
  0x58   : > { %v2252_v56 = vrot.slane %v2154_v41, 2  ;;  %v3806_v57 = vunpack.c.l.bf16 %v599_v32  ;;  %v3808_v63 = vunpack.c.h.bf16 %v599_v32  ;;  %v2012_v5 = vsel %vm1758_vm4, %v2009_v38, %v2011_v46 }
  0x59   : > { %v2117_v6 = vadd.f32 %v2010_v60, %v1873_v40  ;;  %v2253_v7 = vrot.slane %v2155_v49, 2  ;;  %v2255_v8 = vrot.slane %v2156_v47, 2  ;;  %v2118_v59 = vadd.f32 %v2012_v5, %v1874_v45 }
  0x5a   : > { %v671_v9 = vmul.f32 %v3472_v23, %v3642_v54  ;;  %v672_v61 = vmul.f32 %v3472_v23, %v3645_v1  ;;  %v739_v10 = vmul.f32 %v3638_v51, %v3477_v28  ;;  %v740_v18 = vmul.f32 %v3640_v52, %v3477_v28 }
  0x5b   : > { %v2254_v13 = vsel %vm1758_vm4, %v2252_v56, %v2253_v7  ;;  %v2256_v14 = vsel %vm1758_vm4, %v2253_v7, %v2255_v8  ;;  %v807_v19 = vmul.f32 %v3487_v34, %v3806_v57  ;;  %v808_v31 = vmul.f32 %v3487_v34, %v3808_v63  ;;  %v1633_v7 = vld [vmem:[#allocation2 + $0x84] sm:$0xe] }
  0x5c   : > { %v2361_v62 = vadd.f32 %v2254_v13, %v2117_v6  ;;  %v2362_v21 = vadd.f32 %v2256_v14, %v2118_v59  ;;  %v771_v29 = vadd.f32 %v739_v10, %v671_v9  ;;  %v772_v0 = vadd.f32 %v740_v18, %v672_v61  ;;  %v490_v10 = vld [vmem:[%s3450_s10 + $0xa8] sm:$0xf] }
  0x5d   : > { %v3825_v33 = vunpack.c.l.bf16 %v864_v11  ;;  %v920_v27 = vmul.f32 %v3467_v17, %v3642_v54  ;;  %v921_v32 = vmul.f32 %v3467_v17, %v3645_v1  ;;  %v922_v41 = vmul.f32 %v3467_v17, %v3663_v15  ;;  %v491_v11 = vld [vmem:[%s3450_s10 + $0xac] sm:$0xf]  ;;  %541 = vst.msk [vmem:[#allocation2 + $0xb4] sm:$0xf] %vm497_vm1, %v490_v10 }
  0x5e   : > { %v2400_v36 = vadd.f32 %v3636_v50, %v2361_v62  ;;  %v2401_v40 = vadd.f32 %v3636_v50, %v2362_v21  ;;  %v839_v38 = vadd.f32 %v807_v19, %v771_v29  ;;  %v840_v45 = vadd.f32 %v808_v31, %v772_v0  ;;  %542 = vst.msk [vmem:[#allocation2 + $0xb8] sm:$0xf] %vm497_vm1, %v491_v11 }
  0x5f   : > { %v1035_v46 = vrot.slane %v920_v27, 1  ;;  %v1036_v49 = vrot.slane %v921_v32, 1  ;;  %v1165_v47 = vmul.f32 %v3638_v51, %v3491_v37  ;;  %v1038_v5 = vrot.slane %v922_v41, 1 }
  0x60   : > { %v2432_v60 = vmax.f32 %v2400_v36, 0.0  ;;  %v2433_v56 = vmax.f32 %v2401_v40, 0.0  ;;  %v1166_v6 = vmul.f32 %v3640_v52, %v3491_v37  ;;  %v1167_v59 = vmul.f32 %v3491_v37, %v3665_v16  ;;  %v492_v40 = vld [vmem:[%s3450_s10 + $0xb0] sm:$0x1] }
  0x61   : > { %v1037_v8 = vsel %vm989_vm3, %v1035_v46, %v1036_v49  ;;  %v1279_v9 = vrot.slane %v1165_v47, 1  ;;  %v1409_v61 = vmul.f32 %v3500_v42, %v3806_v57  ;;  %v1039_v14 = vsel %vm989_vm3, %v1036_v49, %v1038_v5  ;;  %543 = vst.msk [vmem:[#allocation2 + $0xbc] sm:$0x1] %vm500_vm2, %v492_v40 }
  0x62   : > { %v2463_v13 = vpack.c.bf16 %v2433_v56, %v2432_v60  ;;  %v1120_v18 = vadd.f32 %v1037_v8, %v839_v38  ;;  %v1280_v19 = vrot.slane %v1166_v6, 1  ;;  %v1121_v62 = vadd.f32 %v1039_v14, %v840_v45 }
  0x63   : > { %v1282_v21 = vrot.slane %v1167_v59, 1  ;;  %v1410_v29 = vmul.f32 %v3500_v42, %v3808_v63  ;;  %v1411_v31 = vmul.f32 %v3500_v42, %v3825_v33  ;;  %v1523_v27 = vrot.slane %v1409_v61, 1 }
  0x64   : > { %3286 = vmatmul.mubr.msk.bf16.vlgmr.msra.gmra.mrb[0].mxu0 %vm2486_vm5, %v2463_v13  ;;  %v1281_v0 = vsel %vm989_vm3, %v1279_v9, %v1280_v19  ;;  %v3855_v32 = vunpack.c.l.bf16 %v1633_v7  ;;  %v1689_v36 = vmul.f32 %v3479_v30, %v3699_v24  ;;  %v1690_v47 = vmul.f32 %v3479_v30, %v3645_v1 }
  0x65   : > { %v1283_v38 = vsel %vm989_vm3, %v1280_v19, %v1282_v21  ;;  %v1364_v41 = vadd.f32 %v1281_v0, %v1120_v18  ;;  %v1524_v45 = vrot.slane %v1410_v29, 1  ;;  %v1526_v46 = vrot.slane %v1411_v31, 1  ;;  %v3244_v19 = vld [vmem:[#allocation2 + $0x30] sm:$0xff]  }
  0x66   : > { %v1365_v49 = vadd.f32 %v1283_v38, %v1121_v62  ;;  %v1691_v60 = vmul.f32 %v3479_v30, %v3663_v15  ;;  %v1804_v56 = vrot.slane %v1689_v36, 2  ;;  %v1934_v7 = vmul.f32 %v3502_v43, %v3701_v25 }
  0x67   : > { %v1525_v5 = vsel %vm989_vm3, %v1523_v27, %v1524_v45  ;;  %v1527_v6 = vsel %vm989_vm3, %v1524_v45, %v1526_v46  ;;  %v1935_v8 = vmul.f32 %v3640_v52, %v3502_v43  ;;  %v1805_v61 = vrot.slane %v1690_v47, 2 }
  0x68   : > { %v1608_v59 = vadd.f32 %v1525_v5, %v1364_v41  ;;  %v1609_v9 = vadd.f32 %v1527_v6, %v1365_v49  ;;  %v1807_v10 = vrot.slane %v1691_v60, 2  ;;  %v1936_v11 = vmul.f32 %v3502_v43, %v3665_v16 }
  0x69   : > { %v2048_v13 = vrot.slane %v1934_v7, 2  ;;  %v2049_v14 = vrot.slane %v1935_v8, 2  ;;  %v2178_v18 = vmul.f32 %v3504_v44, %v3855_v32  ;;  %v1806_v62 = vsel %vm1758_vm4, %v1804_v56, %v1805_v61  ;;  %v857_v56 = vld [vmem:[#allocation2 + $0x38] sm:$0x1] }
  0x6a   : > { %v1808_v25 = vsel %vm1758_vm4, %v1805_v61, %v1807_v10  ;;  %v2179_v21 = vmul.f32 %v3504_v44, %v3808_v63  ;;  %v2180_v29 = vmul.f32 %v3504_v44, %v3825_v33  ;;  %v1889_v31 = vadd.f32 %v1806_v62, %v1608_v59 }
  0x6b   : > { %v1890_v0 = vadd.f32 %v1808_v25, %v1609_v9  ;;  %v2050_v27 = vsel %vm1758_vm4, %v2048_v13, %v2049_v14  ;;  %v2051_v36 = vrot.slane %v1936_v11, 2  ;;  %v2292_v40 = vrot.slane %v2178_v18, 2 }
  0x6c   : > { %v2293_v38 = vrot.slane %v2179_v21, 2  ;;  %v2295_v41 = vrot.slane %v2180_v29, 2  ;;  %v3883_v45 = vunpack.c.l.bf16 %v3244_v19  ;;  %v2133_v49 = vadd.f32 %v2050_v27, %v1889_v31 }
  0x6d   : > { %v2052_v46 = vsel %vm1758_vm4, %v2049_v14, %v2051_v36  ;;  %v3886_v47 = vunpack.c.h.bf16 %v3244_v19  ;;  %v657_v60 = vmul.f32 %v3537_v2, %v3472_v23  ;;  %v658_v8 = vmul.f32 %v3539_v3, %v3472_v23 }
  0x6e   : > { %v2134_v5 = vadd.f32 %v2052_v46, %v1890_v0  ;;  %v2294_v6 = vsel %vm1758_vm4, %v2292_v40, %v2293_v38  ;;  %v2296_v7 = vsel %vm1758_vm4, %v2293_v38, %v2295_v41  ;;  %v725_v9 = vmul.f32 %v3477_v28, %v3731_v22 }
  0x6f   : > { %v2377_v59 = vadd.f32 %v2294_v6, %v2133_v49  ;;  %v726_v61 = vmul.f32 %v3477_v28, %v3733_v26  ;;  %v793_v10 = vmul.f32 %v3883_v45, %v3487_v34  ;;  %v794_v13 = vmul.f32 %v3886_v47, %v3487_v34 }
  0x70   : > { %v2378_v11 = vadd.f32 %v2296_v7, %v2134_v5  ;;  %v3902_v14 = vunpack.c.l.bf16 %v857_v56  ;;  %v899_v18 = vmul.f32 %v3537_v2, %v3467_v17  ;;  %v757_v62 = vadd.f32 %v725_v9, %v657_v60 }
  0x71   : > { %v2416_v19 = vadd.f32 %v3636_v50, %v2377_v59  ;;  %v758_v25 = vadd.f32 %v726_v61, %v658_v8  ;;  %v900_v21 = vmul.f32 %v3539_v3, %v3467_v17  ;;  %v901_v31 = vmul.f32 %v3467_v17, %v3541_v4  ;;  %v1626_v8 = vld [vmem:[#allocation2 + $0x30] sm:$0xe] }
  0x72   : > { %v2417_v29 = vadd.f32 %v3636_v50, %v2378_v11  ;;  %v1000_v0 = vrot.slane %v899_v18, 1  ;;  %v1144_v27 = vmul.f32 %v3491_v37, %v3731_v22  ;;  %v825_v40 = vadd.f32 %v793_v10, %v757_v62 }
  0x73   : > { %v2448_v36 = vmax.f32 %v2416_v19, 0.0  ;;  %v826_v38 = vadd.f32 %v794_v13, %v758_v25  ;;  %v1001_v2 = vrot.slane %v900_v21, 1  ;;  %v1003_v46 = vrot.slane %v901_v31, 1 }
  0x74   : > { %v2449_v41 = vmax.f32 %v2417_v29, 0.0  ;;  %v1145_v49 = vmul.f32 %v3491_v37, %v3733_v26  ;;  %v1146_v60 = vmul.f32 %v3491_v37, %v3748_v55  ;;  %v1244_v5 = vrot.slane %v1144_v27, 1 }
  0x75   : > { %v1002_v56 = vsel %vm989_vm3, %v1000_v0, %v1001_v2  ;;  %v1388_v6 = vmul.f32 %v3883_v45, %v3500_v42  ;;  %v1389_v7 = vmul.f32 %v3886_v47, %v3500_v42  ;;  %v1004_v9 = vsel %vm989_vm3, %v1001_v2, %v1003_v46 }
  0x76   : > { %v2471_v59 = vpack.c.bf16 %v2449_v41, %v2448_v36  ;;  %v1106_v61 = vadd.f32 %v1002_v56, %v825_v40  ;;  %v1245_v10 = vrot.slane %v1145_v49, 1  ;;  %v1107_v11 = vadd.f32 %v1004_v9, %v826_v38 }
  0x77   : > { %v1247_v13 = vrot.slane %v1146_v60, 1  ;;  %v1390_v18 = vmul.f32 %v3500_v42, %v3902_v14  ;;  %v1488_v19 = vrot.slane %v1388_v6, 1  ;;  %v1489_v25 = vrot.slane %v1389_v7, 1  ;;  %v3248_v7 = vld [vmem:[#allocation2 + $0x90] sm:$0xff]  }
  0x78   : > { %3302 = vmatmul.mubr.msk.bf16.vlgmr.msra.gmra.mrb[0].mxu1 %vm2486_vm5, %v2471_v59  ;;  %v1246_v62 = vsel %vm989_vm3, %v1244_v5, %v1245_v10  ;;  %v3928_v21 = vunpack.c.l.bf16 %v1626_v8  ;;  %v1669_v29 = vmul.f32 %v3539_v3, %v3479_v30  ;;  %v1670_v36 = vmul.f32 %v3479_v30, %v3541_v4 }
  0x79   : > { %v1248_v31 = vsel %vm989_vm3, %v1245_v10, %v1247_v13  ;;  %v1350_v0 = vadd.f32 %v1246_v62, %v1106_v61  ;;  %v1491_v27 = vrot.slane %v1390_v18, 1  ;;  %v1490_v38 = vsel %vm989_vm3, %v1488_v19, %v1489_v25 }
  0x7a   : > { %v1351_v40 = vadd.f32 %v1248_v31, %v1107_v11  ;;  %v1769_v2 = vrot.slane %v3586_v53, 2  ;;  %v1770_v41 = vrot.slane %v1669_v29, 2  ;;  %v1772_v60 = vrot.slane %v1670_v36, 2  ;;  %v865_v36 = vld [vmem:[#allocation2 + $0x98] sm:$0x1] }
  0x7b   : > { %v1492_v46 = vsel %vm989_vm3, %v1489_v25, %v1491_v27  ;;  %v1594_v49 = vadd.f32 %v1490_v38, %v1350_v0  ;;  %v1913_v3 = vmul.f32 %v3502_v43, %v3778_v58  ;;  %v1914_v6 = vmul.f32 %v3502_v43, %v3733_v26 }
  0x7c   : > { %v1595_v56 = vadd.f32 %v1492_v46, %v1351_v40  ;;  %v1771_v5 = vsel %vm1758_vm4, %v1769_v2, %v1770_v41  ;;  %v1915_v4 = vmul.f32 %v3502_v43, %v3748_v55  ;;  %v1773_v53 = vsel %vm1758_vm4, %v1770_v41, %v1772_v60 }
  0x7d   : > { %v1875_v8 = vadd.f32 %v1771_v5, %v1594_v49  ;;  %v2013_v59 = vrot.slane %v1913_v3, 2  ;;  %v2157_v9 = vmul.f32 %v3504_v44, %v3928_v21  ;;  %v2014_v10 = vrot.slane %v1914_v6, 2 }
  0x7e   : > { %v1876_v61 = vadd.f32 %v1773_v53, %v1595_v56  ;;  %v2016_v11 = vrot.slane %v1915_v4, 2  ;;  %v2158_v13 = vmul.f32 %v3886_v47, %v3504_v44  ;;  %v2159_v18 = vmul.f32 %v3504_v44, %v3902_v14 }
  0x7f   : > { %v2257_v19 = vrot.slane %v2157_v9, 2  ;;  %v3952_v62 = vunpack.c.l.bf16 %v3248_v7  ;;  %v3954_v25 = vunpack.c.h.bf16 %v3248_v7  ;;  %v2015_v29 = vsel %vm1758_vm4, %v2013_v59, %v2014_v10 }
  0x80   : > { %v2017_v31 = vsel %vm1758_vm4, %v2014_v10, %v2016_v11  ;;  %v2258_v0 = vrot.slane %v2158_v13, 2  ;;  %v673_v27 = vmul.f32 %v3638_v51, %v3472_v23  ;;  %v2119_v40 = vadd.f32 %v2015_v29, %v1875_v8 }
  0x81   : > { %v2120_v38 = vadd.f32 %v2017_v31, %v1876_v61  ;;  %v2260_v2 = vrot.slane %v2159_v18, 2  ;;  %v674_v41 = vmul.f32 %v3640_v52, %v3472_v23  ;;  %v741_v49 = vmul.f32 %v3477_v28, %v3806_v57  ;;  %v493_v31 = vld [vmem:[%s3450_s10 + $0xb4] sm:$0xf] }
  0x82   : > { %v2259_v46 = vsel %vm1758_vm4, %v2257_v19, %v2258_v0  ;;  %v742_v60 = vmul.f32 %v3477_v28, %v3808_v63  ;;  %v809_v3 = vmul.f32 %v3952_v62, %v3487_v34  ;;  %v810_v6 = vmul.f32 %v3954_v25, %v3487_v34  ;;  %544 = vst.msk [vmem:[#allocation2 + $0xc0] sm:$0xf] %vm497_vm1, %v493_v31 }
  0x83   : > { %v2261_v56 = vsel %vm1758_vm4, %v2258_v0, %v2260_v2  ;;  %v2363_v5 = vadd.f32 %v2259_v46, %v2119_v40  ;;  %v3972_v4 = vunpack.c.l.bf16 %v865_v36  ;;  %v773_v53 = vadd.f32 %v741_v49, %v673_v27  ;;  %v494_v0 = vld [vmem:[%s3450_s10 + $0xb8] sm:$0xf] }
  0x84   : > { %v2364_v7 = vadd.f32 %v2261_v56, %v2120_v38  ;;  %v774_v8 = vadd.f32 %v742_v60, %v674_v41  ;;  %v923_v59 = vmul.f32 %v3638_v51, %v3467_v17  ;;  %v924_v61 = vmul.f32 %v3640_v52, %v3467_v17  ;;  %545 = vst.msk [vmem:[#allocation2 + $0xc4] sm:$0xf] %vm497_vm1, %v494_v0 }
  0x85   : > { %v2402_v9 = vadd.f32 %v3636_v50, %v2363_v5  ;;  %v925_v10 = vmul.f32 %v3467_v17, %v3665_v16  ;;  %v1168_v11 = vmul.f32 %v3491_v37, %v3806_v57  ;;  %v841_v18 = vadd.f32 %v809_v3, %v773_v53  ;;  %v1634_v5 = vld [vmem:[#allocation2 + $0x90] sm:$0xe] }
  0x86   : > { %v2403_v13 = vadd.f32 %v3636_v50, %v2364_v7  ;;  %v842_v19 = vadd.f32 %v810_v6, %v774_v8  ;;  %v1040_v29 = vrot.slane %v923_v59, 1  ;;  %v1041_v27 = vrot.slane %v924_v61, 1  ;;  %v495_v6 = vld [vmem:[%s3450_s10 + $0xbc] sm:$0x1] }
  0x87   : > { %v2434_v51 = vmax.f32 %v2402_v9, 0.0  ;;  %v1043_v36 = vrot.slane %v925_v10, 1  ;;  %v1169_v40 = vmul.f32 %v3491_v37, %v3808_v63  ;;  %v1170_v2 = vmul.f32 %v3491_v37, %v3825_v33  ;;  %546 = vst.msk [vmem:[#allocation2 + $0xc8] sm:$0x1] %vm500_vm2, %v495_v6 }
  0x88   : > { %v2435_v38 = vmax.f32 %v2403_v13, 0.0  ;;  %v1284_v41 = vrot.slane %v1168_v11, 1  ;;  %v1412_v46 = vmul.f32 %v3952_v62, %v3500_v42  ;;  %v1042_v49 = vsel %vm989_vm3, %v1040_v29, %v1041_v27 }
  0x89   : > { %v1044_v60 = vsel %vm989_vm3, %v1041_v27, %v1043_v36  ;;  %v1285_v3 = vrot.slane %v1169_v40, 1  ;;  %v1413_v56 = vmul.f32 %v3954_v25, %v3500_v42  ;;  %v1122_v53 = vadd.f32 %v1042_v49, %v841_v18 }
  0x8a   : > { %v2464_v7 = vpack.c.bf16 %v2435_v38, %v2434_v51  ;;  %v1123_v8 = vadd.f32 %v1044_v60, %v842_v19  ;;  %v1287_v59 = vrot.slane %v1170_v2, 1  ;;  %v1414_v61 = vmul.f32 %v3500_v42, %v3972_v4 }
  0x8b   : > { %v1286_v9 = vsel %vm989_vm3, %v1284_v41, %v1285_v3  ;;  %v1528_v10 = vrot.slane %v1412_v46, 1  ;;  %v1529_v11 = vrot.slane %v1413_v56, 1  ;;  %v4005_v31 = vunpack.c.l.bf16 %v1634_v5  ;;  %v587_v56 = vld [vmem:[#allocation2 + $0x3c] sm:$0xff]  }
  0x8c   : > { %3289 = vmatprep.mubr.msk.bf16.mxu0 %vm2486_vm5, %v2464_v7  ;;  %v1288_v13 = vsel %vm989_vm3, %v1285_v3, %v1287_v59  ;;  %v1366_v29 = vadd.f32 %v1286_v9, %v1122_v53  ;;  %v1693_v18 = vmul.f32 %v3640_v52, %v3479_v30  ;;  %v1531_v51 = vrot.slane %v1414_v61, 1 }
  0x8d   : > { %v1367_v19 = vadd.f32 %v1288_v13, %v1123_v8  ;;  %v1530_v0 = vsel %vm989_vm3, %v1528_v10, %v1529_v11  ;;  %v1694_v27 = vmul.f32 %v3479_v30, %v3665_v16  ;;  %v1809_v40 = vrot.slane %v3712_v35, 2 }
  0x8e   : > { %v1610_v36 = vadd.f32 %v1530_v0, %v1366_v29  ;;  %v1810_v38 = vrot.slane %v1693_v18, 2  ;;  %v1937_v2 = vmul.f32 %v3502_v43, %v3855_v32  ;;  %v1532_v41 = vsel %vm989_vm3, %v1529_v11, %v1531_v51 }
  0x8f   : > { %v1812_v46 = vrot.slane %v1694_v27, 2  ;;  %v1938_v52 = vmul.f32 %v3502_v43, %v3808_v63  ;;  %v1939_v49 = vmul.f32 %v3502_v43, %v3825_v33  ;;  %v1611_v60 = vadd.f32 %v1532_v41, %v1367_v19 }
  0x90   : > { %v1811_v3 = vsel %vm1758_vm4, %v1809_v40, %v1810_v38  ;;  %v2053_v16 = vrot.slane %v1937_v2, 2  ;;  %v2181_v35 = vmul.f32 %v3504_v44, %v4005_v31  ;;  %v2182_v59 = vmul.f32 %v3954_v25, %v3504_v44  ;;  %v858_v2 = vld [vmem:[#allocation2 + $0x44] sm:$0x1] }
  0x91   : > { %v1813_v5 = vsel %vm1758_vm4, %v1810_v38, %v1812_v46  ;;  %v1891_v6 = vadd.f32 %v1811_v3, %v1610_v36  ;;  %v2054_v7 = vrot.slane %v1938_v52, 2  ;;  %v2056_v53 = vrot.slane %v1939_v49, 2 }
  0x92   : > { %v1892_v8 = vadd.f32 %v1813_v5, %v1611_v60  ;;  %v2183_v9 = vmul.f32 %v3504_v44, %v3972_v4  ;;  %v2297_v61 = vrot.slane %v2181_v35, 2  ;;  %v4030_v13 = vunpack.c.l.bf16 %v587_v56 }
  0x93   : > { %v2055_v10 = vsel %vm1758_vm4, %v2053_v16, %v2054_v7  ;;  %v2057_v11 = vsel %vm1758_vm4, %v2054_v7, %v2056_v53  ;;  %v4032_v29 = vunpack.c.h.bf16 %v587_v56  ;;  %v2298_v0 = vrot.slane %v2182_v59, 2 }
  0x94   : > { %v2135_v18 = vadd.f32 %v2055_v10, %v1891_v6  ;;  %v2136_v19 = vadd.f32 %v2057_v11, %v1892_v8  ;;  %v2300_v51 = vrot.slane %v2183_v9, 2  ;;  %v659_v27 = vmul.f32 %v3472_v23, %v3731_v22 }
  0x95   : > { %v660_v36 = vmul.f32 %v3472_v23, %v3733_v26  ;;  %v727_v40 = vmul.f32 %v3883_v45, %v3477_v28  ;;  %v728_v38 = vmul.f32 %v3886_v47, %v3477_v28  ;;  %v2299_v41 = vsel %vm1758_vm4, %v2297_v61, %v2298_v0 }
  0x96   : > { %v2301_v46 = vsel %vm1758_vm4, %v2298_v0, %v2300_v51  ;;  %v795_v52 = vmul.f32 %v3487_v34, %v4030_v13  ;;  %v796_v49 = vmul.f32 %v3487_v34, %v4032_v29  ;;  %v2379_v60 = vadd.f32 %v2299_v41, %v2135_v18 }
  0x97   : > { %v2380_v3 = vadd.f32 %v2301_v46, %v2136_v19  ;;  %v759_v16 = vadd.f32 %v727_v40, %v659_v27  ;;  %v760_v35 = vadd.f32 %v728_v38, %v660_v36  ;;  %v4048_v56 = vunpack.c.l.bf16 %v858_v2  ;;  %v1627_v38 = vld [vmem:[#allocation2 + $0x3c] sm:$0xe] }
  0x98   : > { %v902_v5 = vmul.f32 %v3467_v17, %v3731_v22  ;;  %v903_v6 = vmul.f32 %v3467_v17, %v3733_v26  ;;  %v904_v7 = vmul.f32 %v3467_v17, %v3748_v55  ;;  %v2418_v53 = vadd.f32 %v3636_v50, %v2379_v60 }
  0x99   : > { %v2419_v8 = vadd.f32 %v3636_v50, %v2380_v3  ;;  %v827_v59 = vadd.f32 %v795_v52, %v759_v16  ;;  %v828_v9 = vadd.f32 %v796_v49, %v760_v35  ;;  %v1147_v18 = vmul.f32 %v3883_v45, %v3491_v37 }
  0x9a   : > { %v1005_v61 = vrot.slane %v902_v5, 1  ;;  %v1006_v10 = vrot.slane %v903_v6, 1  ;;  %v1008_v11 = vrot.slane %v904_v7, 1  ;;  %v2450_v19 = vmax.f32 %v2418_v53, 0.0 }
  0x9b   : > { %v2451_v22 = vmax.f32 %v2419_v8, 0.0  ;;  %v1148_v0 = vmul.f32 %v3886_v47, %v3491_v37  ;;  %v1149_v51 = vmul.f32 %v3491_v37, %v3902_v14  ;;  %v1249_v36 = vrot.slane %v1147_v18, 1 }
  0x9c   : > { %v1007_v27 = vsel %vm989_vm3, %v1005_v61, %v1006_v10  ;;  %v1009_v50 = vsel %vm989_vm3, %v1006_v10, %v1008_v11  ;;  %v1391_v40 = vmul.f32 %v3500_v42, %v4030_v13  ;;  %v1392_v60 = vmul.f32 %v3500_v42, %v4032_v29 }
  0x9d   : > { %v2472_v2 = vpack.c.bf16 %v2451_v22, %v2450_v19  ;;  %v1108_v41 = vadd.f32 %v1007_v27, %v827_v59  ;;  %v1109_v46 = vadd.f32 %v1009_v50, %v828_v9  ;;  %v1250_v52 = vrot.slane %v1148_v0, 1 }
  0x9e   : > { %v1252_v49 = vrot.slane %v1149_v51, 1  ;;  %v1393_v3 = vmul.f32 %v3500_v42, %v4048_v56  ;;  %v1493_v16 = vrot.slane %v1391_v40, 1  ;;  %v4074_v5 = vunpack.c.l.bf16 %v1627_v38 }
  0x9f   : > { %3305 = vmatprep.mubr.msk.bf16.mxu1 %vm2486_vm5, %v2472_v2  ;;  %v1251_v35 = vsel %vm989_vm3, %v1249_v36, %v1250_v52  ;;  %v1671_v6 = vmul.f32 %v3479_v30, %v3778_v58  ;;  %v1672_v7 = vmul.f32 %v3479_v30, %v3733_v26  ;;  %v1494_v59 = vrot.slane %v1392_v60, 1  ;;  %v603_v2 = vld [vmem:[#allocation2 + $0x9c] sm:$0xff]  }
  0xa0   : > { %v1253_v53 = vsel %vm989_vm3, %v1250_v52, %v1252_v49  ;;  %v1352_v8 = vadd.f32 %v1251_v35, %v1108_v41  ;;  %v1496_v9 = vrot.slane %v1393_v3, 1  ;;  %v1673_v10 = vmul.f32 %v3479_v30, %v3748_v55 }
  0xa1   : > { %v1353_v61 = vadd.f32 %v1253_v53, %v1109_v46  ;;  %v1774_v11 = vrot.slane %v1671_v6, 2  ;;  %v1775_v18 = vrot.slane %v1672_v7, 2  ;;  %v1495_v19 = vsel %vm989_vm3, %v1493_v16, %v1494_v59 }
  0xa2   : > { %v1497_v22 = vsel %vm989_vm3, %v1494_v59, %v1496_v9  ;;  %v1916_v58 = vmul.f32 %v3502_v43, %v3928_v21  ;;  %v1917_v26 = vmul.f32 %v3886_v47, %v3502_v43  ;;  %v1596_v0 = vadd.f32 %v1495_v19, %v1352_v8 }
  0xa3   : > { %v1597_v51 = vadd.f32 %v1497_v22, %v1353_v61  ;;  %v1776_v27 = vsel %vm1758_vm4, %v1774_v11, %v1775_v18  ;;  %v1777_v50 = vrot.slane %v1673_v10, 2  ;;  %v1918_v55 = vmul.f32 %v3502_v43, %v3902_v14  ;;  %v866_v11 = vld [vmem:[#allocation2 + $0xa4] sm:$0x1] }
  0xa4   : > { %v2018_v36 = vrot.slane %v1916_v58, 2  ;;  %v2019_v40 = vrot.slane %v1917_v26, 2  ;;  %v2160_v38 = vmul.f32 %v3504_v44, %v4074_v5  ;;  %v1877_v46 = vadd.f32 %v1776_v27, %v1596_v0 }
  0xa5   : > { %v1778_v41 = vsel %vm1758_vm4, %v1775_v18, %v1777_v50  ;;  %v2161_v52 = vmul.f32 %v3504_v44, %v4032_v29  ;;  %v2162_v49 = vmul.f32 %v3504_v44, %v4048_v56  ;;  %v2021_v16 = vrot.slane %v1918_v55, 2 }
  0xa6   : > { %v1878_v60 = vadd.f32 %v1778_v41, %v1597_v51  ;;  %v2020_v3 = vsel %vm1758_vm4, %v2018_v36, %v2019_v40  ;;  %v2262_v35 = vrot.slane %v2160_v38, 2  ;;  %v4100_v8 = vunpack.c.l.bf16 %v603_v2  ;;  %v4126_v38 = vld [vmem:[%s4823_s5] ss:$0 sm:$0xff] }
  0xa7   : > { %v2121_v6 = vadd.f32 %v2020_v3, %v1877_v46  ;;  %v2263_v7 = vrot.slane %v2161_v52, 2  ;;  %v2265_v53 = vrot.slane %v2162_v49, 2  ;;  %v2022_v59 = vsel %vm1758_vm4, %v2019_v40, %v2021_v16 }
  0xa8   : > { %v4103_v9 = vunpack.c.h.bf16 %v603_v2  ;;  %v675_v61 = vmul.f32 %v3472_v23, %v3806_v57  ;;  %v676_v10 = vmul.f32 %v3472_v23, %v3808_v63  ;;  %v2122_v18 = vadd.f32 %v2022_v59, %v1878_v60 }
  0xa9   : > { %v2264_v19 = vsel %vm1758_vm4, %v2262_v35, %v2263_v7  ;;  %v2266_v22 = vsel %vm1758_vm4, %v2263_v7, %v2265_v53  ;;  %v743_v58 = vmul.f32 %v3952_v62, %v3477_v28  ;;  %v744_v0 = vmul.f32 %v3954_v25, %v3477_v28 }
  0xaa   : > { %v2365_v26 = vadd.f32 %v2264_v19, %v2121_v6  ;;  %v811_v51 = vmul.f32 %v3487_v34, %v4100_v8  ;;  %v812_v27 = vmul.f32 %v3487_v34, %v4103_v9  ;;  %v2366_v50 = vadd.f32 %v2266_v22, %v2122_v18 }
  0xab   : > { %v775_v55 = vadd.f32 %v743_v58, %v675_v61  ;;  %v4119_v36 = vunpack.c.l.bf16 %v866_v11  ;;  %v926_v40 = vmul.f32 %v3467_v17, %v3806_v57  ;;  %v776_v41 = vadd.f32 %v744_v0, %v676_v10  ;;  %v1635_v58 = vld [vmem:[#allocation2 + $0x9c] sm:$0xe] }
  0xac   : > { %v2404_v2 = vadd.f32 %v4126_v38, %v2365_v26  ;;  %v927_v46 = vmul.f32 %v3467_v17, %v3808_v63  ;;  %v928_v52 = vmul.f32 %v3467_v17, %v3825_v33  ;;  %v2405_v49 = vadd.f32 %v4126_v38, %v2366_v50 }
  0xad   : > { %v843_v60 = vadd.f32 %v811_v51, %v775_v55  ;;  %v1045_v3 = vrot.slane %v926_v40, 1  ;;  %v1171_v57 = vmul.f32 %v3952_v62, %v3491_v37  ;;  %v844_v35 = vadd.f32 %v812_v27, %v776_v41 }
  0xae   : > { %v2436_v16 = vmax.f32 %v2404_v2, 0.0  ;;  %v1046_v6 = vrot.slane %v927_v46, 1  ;;  %v1048_v7 = vrot.slane %v928_v52, 1  ;;  %v2437_v53 = vmax.f32 %v2405_v49, 0.0 }
  0xaf   : > { %v1172_v59 = vmul.f32 %v3954_v25, %v3491_v37  ;;  %v1173_v61 = vmul.f32 %v3491_v37, %v3972_v4  ;;  %v1289_v10 = vrot.slane %v1171_v57, 1  ;;  %v1415_v19 = vmul.f32 %v3500_v42, %v4100_v8 }
  0xb0   : > { %v1047_v11 = vsel %vm989_vm3, %v1045_v3, %v1046_v6  ;;  %v1049_v18 = vsel %vm989_vm3, %v1046_v6, %v1048_v7  ;;  %v1416_v22 = vmul.f32 %v3500_v42, %v4103_v9  ;;  %v2465_v26 = vpack.c.bf16 %v2437_v53, %v2436_v16 }
  0xb1   : > { %v1124_v0 = vadd.f32 %v1047_v11, %v843_v60  ;;  %v1125_v51 = vadd.f32 %v1049_v18, %v844_v35  ;;  %v1290_v27 = vrot.slane %v1172_v59, 1  ;;  %v1292_v50 = vrot.slane %v1173_v61, 1 }
  0xb2   : > { %v1417_v55 = vmul.f32 %v3500_v42, %v4119_v36  ;;  %v1533_v40 = vrot.slane %v1415_v19, 1  ;;  %v1534_v2 = vrot.slane %v1416_v22, 1  ;;  %3290 = vmatmul.mubr.msk.bf16.gmra.mrb[4].mxu0 %vm2486_vm5, %v2465_v26  ;;  %v4150_v46 = vunpack.c.l.bf16 %v1635_v58  ;;  %v3245_v22 = vld [vmem:[#allocation2 + $0x48] sm:$0xff]  }
  0xb3   : > { %v1291_v41 = vsel %vm989_vm3, %v1289_v10, %v1290_v27  ;;  %v1695_v52 = vmul.f32 %v3479_v30, %v3855_v32  ;;  %v1696_v49 = vmul.f32 %v3479_v30, %v3808_v63  ;;  %v1293_v60 = vsel %vm989_vm3, %v1290_v27, %v1292_v50 }
  0xb4   : > { %v1368_v3 = vadd.f32 %v1291_v41, %v1124_v0  ;;  %v1535_v57 = vsel %vm989_vm3, %v1533_v40, %v1534_v2  ;;  %v1536_v16 = vrot.slane %v1417_v55, 1  ;;  %v1369_v35 = vadd.f32 %v1293_v60, %v1125_v51 }
  0xb5   : > { %v1697_v6 = vmul.f32 %v3479_v30, %v3825_v33  ;;  %v1814_v7 = vrot.slane %v1695_v52, 2  ;;  %v1815_v53 = vrot.slane %v1696_v49, 2  ;;  %v1940_v32 = vmul.f32 %v3502_v43, %v4005_v31 }
  0xb6   : > { %v1537_v59 = vsel %vm989_vm3, %v1534_v2, %v1536_v16  ;;  %v1612_v61 = vadd.f32 %v1535_v57, %v1368_v3  ;;  %v1941_v63 = vmul.f32 %v3954_v25, %v3502_v43  ;;  %v1942_v19 = vmul.f32 %v3502_v43, %v3972_v4 }
  0xb7   : > { %v1613_v10 = vadd.f32 %v1537_v59, %v1369_v35  ;;  %v1816_v11 = vsel %vm1758_vm4, %v1814_v7, %v1815_v53  ;;  %v1817_v18 = vrot.slane %v1697_v6, 2  ;;  %v2058_v58 = vrot.slane %v1940_v32, 2 }
  0xb8   : > { %v1893_v33 = vadd.f32 %v1816_v11, %v1612_v61  ;;  %v2059_v26 = vrot.slane %v1941_v63, 2  ;;  %v2184_v0 = vmul.f32 %v3504_v44, %v4150_v46  ;;  %v2061_v27 = vrot.slane %v1942_v19, 2 }
  0xb9   : > { %v1818_v51 = vsel %vm1758_vm4, %v1815_v53, %v1817_v18  ;;  %v2185_v50 = vmul.f32 %v3504_v44, %v4103_v9  ;;  %v2186_v55 = vmul.f32 %v3504_v44, %v4119_v36  ;;  %v4176_v52 = vunpack.c.l.bf16 %v3245_v22  ;;  %v859_v53 = vld [vmem:[#allocation2 + $0x50] sm:$0x1] }
  0xba   : > { %v1894_v40 = vadd.f32 %v1818_v51, %v1613_v10  ;;  %v2060_v2 = vsel %vm1758_vm4, %v2058_v58, %v2059_v26  ;;  %v2302_v41 = vrot.slane %v2184_v0, 2  ;;  %v2062_v49 = vsel %vm1758_vm4, %v2059_v26, %v2061_v27 }
  0xbb   : > { %v2137_v60 = vadd.f32 %v2060_v2, %v1893_v33  ;;  %v2303_v3 = vrot.slane %v2185_v50, 2  ;;  %v2305_v57 = vrot.slane %v2186_v55, 2  ;;  %v4179_v35 = vunpack.c.h.bf16 %v3245_v22 }
  0xbc   : > { %v2138_v16 = vadd.f32 %v2062_v49, %v1894_v40  ;;  %v661_v6 = vmul.f32 %v3883_v45, %v3472_v23  ;;  %v662_v7 = vmul.f32 %v3886_v47, %v3472_v23  ;;  %v729_v32 = vmul.f32 %v3477_v28, %v4030_v13 }
  0xbd   : > { %v2304_v59 = vsel %vm1758_vm4, %v2302_v41, %v2303_v3  ;;  %v2306_v61 = vsel %vm1758_vm4, %v2303_v3, %v2305_v57  ;;  %v730_v63 = vmul.f32 %v3477_v28, %v4032_v29  ;;  %v797_v18 = vmul.f32 %v4176_v52, %v3487_v34 }
  0xbe   : > { %v2381_v10 = vadd.f32 %v2304_v59, %v2137_v60  ;;  %v2382_v11 = vadd.f32 %v2306_v61, %v2138_v16  ;;  %v798_v19 = vmul.f32 %v4179_v35, %v3487_v34  ;;  %v761_v22 = vadd.f32 %v729_v32, %v661_v6 }
  0xbf   : > { %v762_v33 = vadd.f32 %v730_v63, %v662_v7  ;;  %v4195_v58 = vunpack.c.l.bf16 %v859_v53  ;;  %v905_v26 = vmul.f32 %v3883_v45, %v3467_v17  ;;  %v906_v27 = vmul.f32 %v3886_v47, %v3467_v17  ;;  %v1628_v53 = vld [vmem:[#allocation2 + $0x48] sm:$0xe] }
  0xc0   : > { %v2420_v0 = vadd.f32 %v4126_v38, %v2381_v10  ;;  %v2421_v51 = vadd.f32 %v4126_v38, %v2382_v11  ;;  %v907_v50 = vmul.f32 %v3467_v17, %v3902_v14  ;;  %v829_v55 = vadd.f32 %v797_v18, %v761_v22 }
  0xc1   : > { %v830_v40 = vadd.f32 %v798_v19, %v762_v33  ;;  %v1010_v2 = vrot.slane %v905_v26, 1  ;;  %v1150_v41 = vmul.f32 %v3491_v37, %v4030_v13  ;;  %v1011_v3 = vrot.slane %v906_v27, 1 }
  0xc2   : > { %v2452_v49 = vmax.f32 %v2420_v0, 0.0  ;;  %v2453_v60 = vmax.f32 %v2421_v51, 0.0  ;;  %v1013_v45 = vrot.slane %v907_v50, 1  ;;  %v1151_v57 = vmul.f32 %v3491_v37, %v4032_v29 }
  0xc3   : > { %v1152_v16 = vmul.f32 %v3491_v37, %v4048_v56  ;;  %v1254_v6 = vrot.slane %v1150_v41, 1  ;;  %v1394_v7 = vmul.f32 %v4176_v52, %v3500_v42  ;;  %v1012_v61 = vsel %vm989_vm3, %v1010_v2, %v1011_v3 }
  0xc4   : > { %v2473_v59 = vpack.c.bf16 %v2453_v60, %v2452_v49  ;;  %v1014_v32 = vsel %vm989_vm3, %v1011_v3, %v1013_v45  ;;  %v1395_v63 = vmul.f32 %v4179_v35, %v3500_v42  ;;  %v1110_v10 = vadd.f32 %v1012_v61, %v829_v55 }
  0xc5   : > { %v1111_v11 = vadd.f32 %v1014_v32, %v830_v40  ;;  %v1255_v18 = vrot.slane %v1151_v57, 1  ;;  %v1257_v19 = vrot.slane %v1152_v16, 1  ;;  %v1396_v22 = vmul.f32 %v3500_v42, %v4195_v58 }
  0xc6   : > { %3306 = vmatmul.mubr.msk.bf16.gmra.mrb[4].mxu1 %vm2486_vm5, %v2473_v59  ;;  %v1498_v33 = vrot.slane %v1394_v7, 1  ;;  %v1499_v26 = vrot.slane %v1395_v63, 1  ;;  %v4220_v0 = vunpack.c.l.bf16 %v1628_v53  ;;  %v1674_v50 = vmul.f32 %v3479_v30, %v3928_v21  ;;  %v3249_v7 = vld [vmem:[#allocation2 + $0xa8] sm:$0xff]  }
  0xc7   : > { %v1256_v51 = vsel %vm989_vm3, %v1254_v6, %v1255_v18  ;;  %v1258_v27 = vsel %vm989_vm3, %v1255_v18, %v1257_v19  ;;  %v1675_v55 = vmul.f32 %v3886_v47, %v3479_v30  ;;  %v1501_v49 = vrot.slane %v1396_v22, 1 }
  0xc8   : > { %v1354_v40 = vadd.f32 %v1256_v51, %v1110_v10  ;;  %v1355_v2 = vadd.f32 %v1258_v27, %v1111_v11  ;;  %v1500_v41 = vsel %vm989_vm3, %v1498_v33, %v1499_v26  ;;  %v1676_v60 = vmul.f32 %v3479_v30, %v3902_v14 }
  0xc9   : > { %v1779_v3 = vrot.slane %v1674_v50, 2  ;;  %v1780_v45 = vrot.slane %v1675_v55, 2  ;;  %v1919_v57 = vmul.f32 %v3502_v43, %v4074_v5  ;;  %v1502_v16 = vsel %vm989_vm3, %v1499_v26, %v1501_v49 }
  0xca   : > { %v1598_v6 = vadd.f32 %v1500_v41, %v1354_v40  ;;  %v1920_v21 = vmul.f32 %v3502_v43, %v4032_v29  ;;  %v1921_v47 = vmul.f32 %v3502_v43, %v4048_v56  ;;  %v1599_v53 = vadd.f32 %v1502_v16, %v1355_v2 }
  0xcb   : > { %v1781_v59 = vsel %vm1758_vm4, %v1779_v3, %v1780_v45  ;;  %v1782_v61 = vrot.slane %v1676_v60, 2  ;;  %v2023_v14 = vrot.slane %v1919_v57, 2  ;;  %v2163_v11 = vmul.f32 %v3504_v44, %v4220_v0  ;;  %v867_v57 = vld [vmem:[#allocation2 + $0xb0] sm:$0x1] }
  0xcc   : > { %v1879_v32 = vadd.f32 %v1781_v59, %v1598_v6  ;;  %v2024_v63 = vrot.slane %v1920_v21, 2  ;;  %v2026_v10 = vrot.slane %v1921_v47, 2  ;;  %v2164_v19 = vmul.f32 %v4179_v35, %v3504_v44 }
  0xcd   : > { %v1783_v18 = vsel %vm1758_vm4, %v1780_v45, %v1782_v61  ;;  %v2165_v22 = vmul.f32 %v3504_v44, %v4195_v58  ;;  %v4246_v33 = vunpack.c.l.bf16 %v3249_v7  ;;  %v2267_v50 = vrot.slane %v2163_v11, 2 }
  0xce   : > { %v1880_v26 = vadd.f32 %v1783_v18, %v1599_v53  ;;  %v2025_v51 = vsel %vm1758_vm4, %v2023_v14, %v2024_v63  ;;  %v2027_v27 = vsel %vm1758_vm4, %v2024_v63, %v2026_v10  ;;  %v2268_v40 = vrot.slane %v2164_v19, 2 }
  0xcf   : > { %v2123_v55 = vadd.f32 %v2025_v51, %v1879_v32  ;;  %v2270_v2 = vrot.slane %v2165_v22, 2  ;;  %v4250_v41 = vunpack.c.h.bf16 %v3249_v7  ;;  %v677_v60 = vmul.f32 %v3952_v62, %v3472_v23 }
  0xd0   : > { %v2124_v49 = vadd.f32 %v2027_v27, %v1880_v26  ;;  %v678_v3 = vmul.f32 %v3954_v25, %v3472_v23  ;;  %v745_v45 = vmul.f32 %v3477_v28, %v4100_v8  ;;  %v2269_v16 = vsel %vm1758_vm4, %v2267_v50, %v2268_v40 }
  0xd1   : > { %v2271_v6 = vsel %vm1758_vm4, %v2268_v40, %v2270_v2  ;;  %v746_v21 = vmul.f32 %v3477_v28, %v4103_v9  ;;  %v813_v47 = vmul.f32 %v4246_v33, %v3487_v34  ;;  %v2367_v7 = vadd.f32 %v2269_v16, %v2123_v55 }
  0xd2   : > { %v2368_v53 = vadd.f32 %v2271_v6, %v2124_v49  ;;  %v777_v59 = vadd.f32 %v745_v45, %v677_v60  ;;  %v814_v61 = vmul.f32 %v4250_v41, %v3487_v34  ;;  %v4266_v32 = vunpack.c.l.bf16 %v867_v57  ;;  %v1636_v57 = vld [vmem:[#allocation2 + $0xa8] sm:$0xe] }
  0xd3   : > { %v778_v14 = vadd.f32 %v746_v21, %v678_v3  ;;  %v929_v63 = vmul.f32 %v3952_v62, %v3467_v17  ;;  %v930_v10 = vmul.f32 %v3954_v25, %v3467_v17  ;;  %v2406_v11 = vadd.f32 %v4126_v38, %v2367_v7 }
  0xd4   : > { %v2407_v18 = vadd.f32 %v4126_v38, %v2368_v53  ;;  %v845_v19 = vadd.f32 %v813_v47, %v777_v59  ;;  %v931_v22 = vmul.f32 %v3467_v17, %v3972_v4  ;;  %v1174_v50 = vmul.f32 %v3491_v37, %v4100_v8 }
  0xd5   : > { %v846_v26 = vadd.f32 %v814_v61, %v778_v14  ;;  %v1050_v51 = vrot.slane %v929_v63, 1  ;;  %v1051_v27 = vrot.slane %v930_v10, 1  ;;  %v2438_v55 = vmax.f32 %v2406_v11, 0.0 }
  0xd6   : > { %v2439_v40 = vmax.f32 %v2407_v18, 0.0  ;;  %v1053_v62 = vrot.slane %v931_v22, 1  ;;  %v1175_v2 = vmul.f32 %v3491_v37, %v4103_v9  ;;  %v1176_v60 = vmul.f32 %v3491_v37, %v4119_v36 }
  0xd7   : > { %v1052_v49 = vsel %vm989_vm3, %v1050_v51, %v1051_v27  ;;  %v1294_v3 = vrot.slane %v1174_v50, 1  ;;  %v1418_v45 = vmul.f32 %v4246_v33, %v3500_v42  ;;  %v1419_v59 = vmul.f32 %v4250_v41, %v3500_v42 }
  0xd8   : > { %v2466_v16 = vpack.c.bf16 %v2439_v40, %v2438_v55  ;;  %v1054_v6 = vsel %vm989_vm3, %v1051_v27, %v1053_v62  ;;  %v1126_v21 = vadd.f32 %v1052_v49, %v845_v19  ;;  %v1295_v47 = vrot.slane %v1175_v2, 1 }
  0xd9   : > { %v1127_v7 = vadd.f32 %v1054_v6, %v846_v26  ;;  %v1297_v53 = vrot.slane %v1176_v60, 1  ;;  %v1420_v61 = vmul.f32 %v3500_v42, %v4266_v32  ;;  %v1538_v63 = vrot.slane %v1418_v45, 1  ;;  %v591_v6 = vld [vmem:[#allocation2 + $0x54] sm:$0xff]  }
  0xda   : > { %3293 = vmatprep.mubr.msk.bf16.mxu0 %vm2486_vm5, %v2466_v16  ;;  %v1296_v14 = vsel %vm989_vm3, %v1294_v3, %v1295_v47  ;;  %v4292_v10 = vunpack.c.l.bf16 %v1636_v57  ;;  %v1698_v11 = vmul.f32 %v3479_v30, %v4005_v31  ;;  %v1539_v22 = vrot.slane %v1419_v59, 1 }
  0xdb   : > { %v1298_v18 = vsel %vm989_vm3, %v1295_v47, %v1297_v53  ;;  %v1370_v19 = vadd.f32 %v1296_v14, %v1126_v21  ;;  %v1541_v26 = vrot.slane %v1420_v61, 1  ;;  %v1699_v27 = vmul.f32 %v3954_v25, %v3479_v30 }
  0xdc   : > { %v1371_v51 = vadd.f32 %v1298_v18, %v1127_v7  ;;  %v1700_v50 = vmul.f32 %v3479_v30, %v3972_v4  ;;  %v1819_v55 = vrot.slane %v1698_v11, 2  ;;  %v1540_v40 = vsel %vm989_vm3, %v1538_v63, %v1539_v22 }
  0xdd   : > { %v1542_v62 = vsel %vm989_vm3, %v1539_v22, %v1541_v26  ;;  %v1943_v31 = vmul.f32 %v3502_v43, %v4150_v46  ;;  %v1944_v2 = vmul.f32 %v3502_v43, %v4103_v9  ;;  %v1614_v49 = vadd.f32 %v1540_v40, %v1370_v19 }
  0xde   : > { %v1615_v60 = vadd.f32 %v1542_v62, %v1371_v51  ;;  %v1820_v3 = vrot.slane %v1699_v27, 2  ;;  %v1822_v45 = vrot.slane %v1700_v50, 2  ;;  %v1945_v25 = vmul.f32 %v3502_v43, %v4119_v36 }
  0xdf   : > { %v2063_v57 = vrot.slane %v1943_v31, 2  ;;  %v2064_v4 = vrot.slane %v1944_v2, 2  ;;  %v2187_v16 = vmul.f32 %v3504_v44, %v4292_v10  ;;  %v2188_v7 = vmul.f32 %v4250_v41, %v3504_v44 }
  0xe0   : > { %v1821_v21 = vsel %vm1758_vm4, %v1819_v55, %v1820_v3  ;;  %v1823_v47 = vsel %vm1758_vm4, %v1820_v3, %v1822_v45  ;;  %v2189_v53 = vmul.f32 %v3504_v44, %v4266_v32  ;;  %v2066_v63 = vrot.slane %v1945_v25, 2  ;;  %v860_v55 = vld [vmem:[#allocation2 + $0x5c] sm:$0x1] }
  0xe1   : > { %v1895_v59 = vadd.f32 %v1821_v21, %v1614_v49  ;;  %v1896_v61 = vadd.f32 %v1823_v47, %v1615_v60  ;;  %v2065_v14 = vsel %vm1758_vm4, %v2063_v57, %v2064_v4  ;;  %v2307_v11 = vrot.slane %v2187_v16, 2 }
  0xe2   : > { %v2308_v18 = vrot.slane %v2188_v7, 2  ;;  %v2310_v19 = vrot.slane %v2189_v53, 2  ;;  %v4318_v22 = vunpack.c.l.bf16 %v591_v6  ;;  %v2067_v26 = vsel %vm1758_vm4, %v2064_v4, %v2066_v63 }
  0xe3   : > { %v2139_v51 = vadd.f32 %v2065_v14, %v1895_v59  ;;  %v4321_v27 = vunpack.c.h.bf16 %v591_v6  ;;  %v663_v50 = vmul.f32 %v3472_v23, %v4030_v13  ;;  %v2140_v40 = vadd.f32 %v2067_v26, %v1896_v61 }
  0xe4   : > { %v2309_v62 = vsel %vm1758_vm4, %v2307_v11, %v2308_v18  ;;  %v2311_v31 = vsel %vm1758_vm4, %v2308_v18, %v2310_v19  ;;  %v664_v2 = vmul.f32 %v3472_v23, %v4032_v29  ;;  %v731_v60 = vmul.f32 %v4176_v52, %v3477_v28 }
  0xe5   : > { %v2383_v49 = vadd.f32 %v2309_v62, %v2139_v51  ;;  %v732_v3 = vmul.f32 %v4179_v35, %v3477_v28  ;;  %v799_v45 = vmul.f32 %v3487_v34, %v4318_v22  ;;  %v2384_v25 = vadd.f32 %v2311_v31, %v2140_v40 }
  0xe6   : > { %v800_v57 = vmul.f32 %v3487_v34, %v4321_v27  ;;  %v4337_v4 = vunpack.c.l.bf16 %v860_v55  ;;  %v908_v16 = vmul.f32 %v3467_v17, %v4030_v13  ;;  %v763_v21 = vadd.f32 %v731_v60, %v663_v50 }
  0xe7   : > { %v2422_v6 = vadd.f32 %v4126_v38, %v2383_v49  ;;  %v764_v47 = vadd.f32 %v732_v3, %v664_v2  ;;  %v909_v7 = vmul.f32 %v3467_v17, %v4032_v29  ;;  %v2423_v53 = vadd.f32 %v4126_v38, %v2384_v25  ;;  %v1629_v2 = vld [vmem:[#allocation2 + $0x54] sm:$0xe] }
  0xe8   : > { %v910_v59 = vmul.f32 %v3467_v17, %v4048_v56  ;;  %v1015_v61 = vrot.slane %v908_v16, 1  ;;  %v1153_v14 = vmul.f32 %v4176_v52, %v3491_v37  ;;  %v831_v11 = vadd.f32 %v799_v45, %v763_v21 }
  0xe9   : > { %v2454_v63 = vmax.f32 %v2422_v6, 0.0  ;;  %v832_v18 = vadd.f32 %v800_v57, %v764_v47  ;;  %v1016_v13 = vrot.slane %v909_v7, 1  ;;  %v2455_v19 = vmax.f32 %v2423_v53, 0.0 }
  0xea   : > { %v1018_v26 = vrot.slane %v910_v59, 1  ;;  %v1154_v51 = vmul.f32 %v4179_v35, %v3491_v37  ;;  %v1155_v50 = vmul.f32 %v3491_v37, %v4195_v58  ;;  %v1259_v40 = vrot.slane %v1153_v14, 1 }
  0xeb   : > { %v1017_v55 = vsel %vm989_vm3, %v1015_v61, %v1016_v13  ;;  %v1397_v62 = vmul.f32 %v3500_v42, %v4318_v22  ;;  %v1398_v31 = vmul.f32 %v3500_v42, %v4321_v27  ;;  %v2474_v49 = vpack.c.bf16 %v2455_v19, %v2454_v63 }
  0xec   : > { %v1019_v60 = vsel %vm989_vm3, %v1016_v13, %v1018_v26  ;;  %v1112_v3 = vadd.f32 %v1017_v55, %v831_v11  ;;  %v1260_v45 = vrot.slane %v1154_v51, 1  ;;  %v1262_v57 = vrot.slane %v1155_v50, 1 }
  0xed   : > { %v1113_v25 = vadd.f32 %v1019_v60, %v832_v18  ;;  %v1399_v16 = vmul.f32 %v3500_v42, %v4337_v4  ;;  %v1503_v6 = vrot.slane %v1397_v62, 1  ;;  %3309 = vmatprep.mubr.msk.bf16.mxu1 %vm2486_vm5, %v2474_v49  ;;  %v1504_v47 = vrot.slane %v1398_v31, 1  ;;  %v607_v60 = vld [vmem:[#allocation2 + $0xb4] sm:$0xff]  }
  0xee   : > { %v1261_v21 = vsel %vm989_vm3, %v1259_v40, %v1260_v45  ;;  %v4363_v7 = vunpack.c.l.bf16 %v1629_v2  ;;  %v1677_v53 = vmul.f32 %v3479_v30, %v4074_v5  ;;  %v1263_v59 = vsel %vm989_vm3, %v1260_v45, %v1262_v57 }
  0xef   : > { %v1356_v61 = vadd.f32 %v1261_v21, %v1112_v3  ;;  %v1506_v14 = vrot.slane %v1399_v16, 1  ;;  %v1678_v63 = vmul.f32 %v3479_v30, %v4032_v29  ;;  %v1357_v11 = vadd.f32 %v1263_v59, %v1113_v25 }
  0xf0   : > { %v1505_v18 = vsel %vm989_vm3, %v1503_v6, %v1504_v47  ;;  %v1679_v13 = vmul.f32 %v3479_v30, %v4048_v56  ;;  %v1784_v19 = vrot.slane %v1677_v53, 2  ;;  %v1922_v5 = vmul.f32 %v3502_v43, %v4220_v0 }
  0xf1   : > { %v1507_v26 = vsel %vm989_vm3, %v1504_v47, %v1506_v14  ;;  %v1600_v51 = vadd.f32 %v1505_v18, %v1356_v61  ;;  %v1785_v50 = vrot.slane %v1678_v63, 2  ;;  %v1923_v62 = vmul.f32 %v4179_v35, %v3502_v43 }
  0xf2   : > { %v1601_v55 = vadd.f32 %v1507_v26, %v1357_v11  ;;  %v1787_v40 = vrot.slane %v1679_v13, 2  ;;  %v1924_v29 = vmul.f32 %v3502_v43, %v4195_v58  ;;  %v2028_v2 = vrot.slane %v1922_v5, 2 }
  0xf3   : > { %v1786_v31 = vsel %vm1758_vm4, %v1784_v19, %v1785_v50  ;;  %v2166_v56 = vmul.f32 %v3504_v44, %v4363_v7  ;;  %v2167_v49 = vmul.f32 %v3504_v44, %v4321_v27  ;;  %v2029_v25 = vrot.slane %v1923_v62, 2  ;;  %v868_v19 = vld [vmem:[#allocation2 + $0xbc] sm:$0x1] }
  0xf4   : > { %v1788_v3 = vsel %vm1758_vm4, %v1785_v50, %v1787_v40  ;;  %v1881_v45 = vadd.f32 %v1786_v31, %v1600_v51  ;;  %v2031_v57 = vrot.slane %v1924_v29, 2  ;;  %v2168_v6 = vmul.f32 %v3504_v44, %v4337_v4 }
  0xf5   : > { %v1882_v16 = vadd.f32 %v1788_v3, %v1601_v55  ;;  %v2272_v21 = vrot.slane %v2166_v56, 2  ;;  %v2273_v47 = vrot.slane %v2167_v49, 2  ;;  %v2030_v53 = vsel %vm1758_vm4, %v2028_v2, %v2029_v25 }
  0xf6   : > { %v2032_v59 = vsel %vm1758_vm4, %v2029_v25, %v2031_v57  ;;  %v4390_v61 = vunpack.c.l.bf16 %v607_v60  ;;  %v4392_v14 = vunpack.c.h.bf16 %v607_v60  ;;  %v2125_v63 = vadd.f32 %v2030_v53, %v1881_v45 }
  0xf7   : > { %v2126_v11 = vadd.f32 %v2032_v59, %v1882_v16  ;;  %v2274_v18 = vsel %vm1758_vm4, %v2272_v21, %v2273_v47  ;;  %v2275_v13 = vrot.slane %v2168_v6, 2  ;;  %v679_v26 = vmul.f32 %v3472_v23, %v4100_v8 }
  0xf8   : > { %v680_v51 = vmul.f32 %v3472_v23, %v4103_v9  ;;  %v747_v50 = vmul.f32 %v4246_v33, %v3477_v28  ;;  %v748_v5 = vmul.f32 %v4250_v41, %v3477_v28  ;;  %v2369_v40 = vadd.f32 %v2274_v18, %v2125_v63 }
  0xf9   : > { %v2276_v55 = vsel %vm1758_vm4, %v2273_v47, %v2275_v13  ;;  %v815_v62 = vmul.f32 %v3487_v34, %v4390_v61  ;;  %v816_v29 = vmul.f32 %v3487_v34, %v4392_v14  ;;  %v4408_v49 = vunpack.c.l.bf16 %v868_v19 }
  0xfa   : > { %v2370_v31 = vadd.f32 %v2276_v55, %v2126_v11  ;;  %v779_v2 = vadd.f32 %v747_v50, %v679_v26  ;;  %v780_v56 = vadd.f32 %v748_v5, %v680_v51  ;;  %v2408_v60 = vadd.f32 %v4126_v38, %v2369_v40  ;;  %v1637_v5 = vld [vmem:[#allocation2 + $0xb4] sm:$0xe] }
  0xfb   : > { %v932_v3 = vmul.f32 %v3467_v17, %v4100_v8  ;;  %v933_v45 = vmul.f32 %v3467_v17, %v4103_v9  ;;  %v934_v25 = vmul.f32 %v3467_v17, %v4119_v36  ;;  %v1177_v21 = vmul.f32 %v4246_v33, %v3491_v37 }
  0xfc   : > { %v2409_v57 = vadd.f32 %v4126_v38, %v2370_v31  ;;  %v847_v16 = vadd.f32 %v815_v62, %v779_v2  ;;  %v848_v6 = vadd.f32 %v816_v29, %v780_v56  ;;  %v2440_v47 = vmax.f32 %v2408_v60, 0.0 }
  0xfd   : > { %v1055_v53 = vrot.slane %v932_v3, 1  ;;  %v1056_v59 = vrot.slane %v933_v45, 1  ;;  %v1058_v63 = vrot.slane %v934_v25, 1  ;;  %v1178_v8 = vmul.f32 %v4250_v41, %v3491_v37 }
  0xfe   : > { %v2441_v11 = vmax.f32 %v2409_v57, 0.0  ;;  %v1179_v18 = vmul.f32 %v3491_v37, %v4266_v32  ;;  %v1299_v13 = vrot.slane %v1177_v21, 1  ;;  %v1421_v51 = vmul.f32 %v3500_v42, %v4390_v61 }
  0xff   : > { %v1057_v19 = vsel %vm989_vm3, %v1055_v53, %v1056_v59  ;;  %v1059_v26 = vsel %vm989_vm3, %v1056_v59, %v1058_v63  ;;  %v1422_v50 = vmul.f32 %v3500_v42, %v4392_v14  ;;  %v1300_v29 = vrot.slane %v1178_v8, 1 }
 0x100   : > { %v2467_v55 = vpack.c.bf16 %v2441_v11, %v2440_v47  ;;  %v1128_v40 = vadd.f32 %v1057_v19, %v847_v16  ;;  %v1129_v62 = vadd.f32 %v1059_v26, %v848_v6  ;;  %v1302_v31 = vrot.slane %v1179_v18, 1 }
 0x101   : > { %v1423_v2 = vmul.f32 %v3500_v42, %v4408_v49  ;;  %v1543_v56 = vrot.slane %v1421_v51, 1  ;;  %v1544_v60 = vrot.slane %v1422_v50, 1  ;;  %v1301_v3 = vsel %vm989_vm3, %v1299_v13, %v1300_v29 }
 0x102   : > { %3294 = vmatmul.mubr.msk.bf16.gmra.mrb[8].mxu0 %vm2486_vm5, %v2467_v55  ;;  %v4434_v45 = vunpack.c.l.bf16 %v1637_v5  ;;  %v1701_v25 = vmul.f32 %v3479_v30, %v4150_v46  ;;  %v1702_v57 = vmul.f32 %v3479_v30, %v4103_v9  ;;  %v1303_v16 = vsel %vm989_vm3, %v1300_v29, %v1302_v31 }
 0x103   : > { %v1372_v6 = vadd.f32 %v1301_v3, %v1128_v40  ;;  %v1545_v21 = vsel %vm989_vm3, %v1543_v56, %v1544_v60  ;;  %v1546_v47 = vrot.slane %v1423_v2, 1  ;;  %v1373_v53 = vadd.f32 %v1303_v16, %v1129_v62 }
 0x104   : > { %v1703_v59 = vmul.f32 %v3479_v30, %v4119_v36  ;;  %v1824_v63 = vrot.slane %v1701_v25, 2  ;;  %v1825_v11 = vrot.slane %v1702_v57, 2  ;;  %v1946_v46 = vmul.f32 %v3502_v43, %v4292_v10 }
 0x105   : > { %v1547_v8 = vsel %vm989_vm3, %v1544_v60, %v1546_v47  ;;  %v1616_v18 = vadd.f32 %v1545_v21, %v1372_v6  ;;  %v1947_v9 = vmul.f32 %v4250_v41, %v3502_v43  ;;  %v1948_v51 = vmul.f32 %v3502_v43, %v4266_v32 }
 0x106   : > { %v1617_v13 = vadd.f32 %v1547_v8, %v1373_v53  ;;  %v1826_v19 = vsel %vm1758_vm4, %v1824_v63, %v1825_v11  ;;  %v1827_v26 = vrot.slane %v1703_v59, 2  ;;  %v2068_v36 = vrot.slane %v1946_v46, 2 }
 0x107   : > { %v1897_v50 = vadd.f32 %v1826_v19, %v1616_v18  ;;  %v2069_v5 = vrot.slane %v1947_v9, 2  ;;  %v2190_v55 = vmul.f32 %v3504_v44, %v4434_v45  ;;  %v2071_v62 = vrot.slane %v1948_v51, 2 }
 0x108   : > { %v1828_v40 = vsel %vm1758_vm4, %v1825_v11, %v1827_v26  ;;  %v2191_v29 = vmul.f32 %v3504_v44, %v4392_v14  ;;  %v2192_v31 = vmul.f32 %v3504_v44, %v4408_v49  ;;  %v665_v3 = vmul.f32 %v4176_v52, %v3472_v23 }
 0x109   : > { %v1898_v2 = vadd.f32 %v1828_v40, %v1617_v13  ;;  %v2070_v56 = vsel %vm1758_vm4, %v2068_v36, %v2069_v5  ;;  %v2312_v60 = vrot.slane %v2190_v55, 2  ;;  %v2072_v25 = vsel %vm1758_vm4, %v2069_v5, %v2071_v62 }
 0x10a   : > { %v2141_v57 = vadd.f32 %v2070_v56, %v1897_v50  ;;  %v2313_v16 = vrot.slane %v2191_v29, 2  ;;  %v2315_v6 = vrot.slane %v2192_v31, 2  ;;  %v666_v47 = vmul.f32 %v4179_v35, %v3472_v23 }
 0x10b   : > { %v2142_v21 = vadd.f32 %v2072_v25, %v1898_v2  ;;  %v733_v53 = vmul.f32 %v3477_v28, %v4318_v22  ;;  %v734_v59 = vmul.f32 %v3477_v28, %v4321_v27  ;;  %v801_v8 = vmul.f32 %v3627_v39, %v3487_v34 }
 0x10c   : > { %v2314_v63 = vsel %vm1758_vm4, %v2312_v60, %v2313_v16  ;;  %v2316_v11 = vsel %vm1758_vm4, %v2313_v16, %v2315_v6  ;;  %v802_v18 = vmul.f32 %v3630_v48, %v3487_v34  ;;  %v911_v26 = vmul.f32 %v4176_v52, %v3467_v17 }
 0x10d   : > { %v2385_v46 = vadd.f32 %v2314_v63, %v2141_v57  ;;  %v2386_v9 = vadd.f32 %v2316_v11, %v2142_v21  ;;  %v765_v13 = vadd.f32 %v733_v53, %v665_v3  ;;  %v766_v19 = vadd.f32 %v734_v59, %v666_v47 }
 0x10e   : > { %v912_v51 = vmul.f32 %v4179_v35, %v3467_v17  ;;  %v913_v50 = vmul.f32 %v3467_v17, %v4195_v58  ;;  %v1156_v36 = vmul.f32 %v3491_v37, %v4318_v22  ;;  %v1020_v29 = vrot.slane %v911_v26, 1 }
 0x10f   : > { %v2424_v5 = vadd.f32 %v4126_v38, %v2385_v46  ;;  %v2425_v55 = vadd.f32 %v4126_v38, %v2386_v9  ;;  %v833_v40 = vadd.f32 %v801_v8, %v765_v13  ;;  %v834_v62 = vadd.f32 %v802_v18, %v766_v19 }
 0x110   : > { %v1021_v31 = vrot.slane %v912_v51, 1  ;;  %v1023_v2 = vrot.slane %v913_v50, 1  ;;  %v1157_v52 = vmul.f32 %v3491_v37, %v4321_v27  ;;  %v1158_v3 = vmul.f32 %v3491_v37, %v4337_v4 }
 0x111   : > { %v2456_v56 = vmax.f32 %v2424_v5, 0.0  ;;  %v2457_v60 = vmax.f32 %v2425_v55, 0.0  ;;  %v1264_v25 = vrot.slane %v1156_v36, 1  ;;  %v1400_v21 = vmul.f32 %v3627_v39, %v3500_v42 }
 0x112   : > { %v1022_v57 = vsel %vm989_vm3, %v1020_v29, %v1021_v31  ;;  %v1024_v16 = vsel %vm989_vm3, %v1021_v31, %v1023_v2  ;;  %v1265_v6 = vrot.slane %v1157_v52, 1  ;;  %v1267_v63 = vrot.slane %v1158_v3, 1  ;;  %v3250_v3 = vld [vmem:[#allocation2 + $0xc0] sm:$0xff]  }
 0x113   : > { %v2475_v47 = vpack.c.bf16 %v2457_v60, %v2456_v56  ;;  %v1114_v53 = vadd.f32 %v1022_v57, %v833_v40  ;;  %v1115_v59 = vadd.f32 %v1024_v16, %v834_v62  ;;  %v1401_v8 = vmul.f32 %v3630_v48, %v3500_v42 }
 0x114   : > { %v1266_v11 = vsel %vm989_vm3, %v1264_v25, %v1265_v6  ;;  %v1402_v18 = vmul.f32 %v3500_v42, %v3660_v12  ;;  %v1508_v46 = vrot.slane %v1400_v21, 1  ;;  %v1268_v9 = vsel %vm989_vm3, %v1265_v6, %v1267_v63 }
 0x115   : > { %3310 = vmatmul.mubr.msk.bf16.gmra.mrb[8].mxu1 %vm2486_vm5, %v2475_v47  ;;  %v1358_v13 = vadd.f32 %v1266_v11, %v1114_v53  ;;  %v1680_v19 = vmul.f32 %v3479_v30, %v4220_v0  ;;  %v1681_v26 = vmul.f32 %v4179_v35, %v3479_v30  ;;  %v1359_v51 = vadd.f32 %v1268_v9, %v1115_v59 }
 0x116   : > { %v1509_v50 = vrot.slane %v1401_v8, 1  ;;  %v1511_v36 = vrot.slane %v1402_v18, 1  ;;  %v1682_v5 = vmul.f32 %v3479_v30, %v4195_v58  ;;  %v1925_v62 = vmul.f32 %v3502_v43, %v4363_v7 }
 0x117   : > { %v1789_v55 = vrot.slane %v1680_v19, 2  ;;  %v1790_v40 = vrot.slane %v1681_v26, 2  ;;  %v1926_v29 = vmul.f32 %v3502_v43, %v4321_v27  ;;  %v1927_v35 = vmul.f32 %v3502_v43, %v4337_v4 }
 0x118   : > { %v1510_v31 = vsel %vm989_vm3, %v1508_v46, %v1509_v50  ;;  %v1512_v0 = vsel %vm989_vm3, %v1509_v50, %v1511_v36  ;;  %v1792_v2 = vrot.slane %v1682_v5, 2  ;;  %v2033_v60 = vrot.slane %v1925_v62, 2  ;;  %v869_v5 = vld [vmem:[#allocation2 + $0xc8] sm:$0x1] }
 0x119   : > { %v1602_v52 = vadd.f32 %v1510_v31, %v1358_v13  ;;  %v1603_v56 = vadd.f32 %v1512_v0, %v1359_v51  ;;  %v1791_v58 = vsel %vm1758_vm4, %v1789_v55, %v1790_v40  ;;  %v2034_v57 = vrot.slane %v1926_v29, 2 }
 0x11a   : > { %v1793_v25 = vsel %vm1758_vm4, %v1790_v40, %v1792_v2  ;;  %v2036_v16 = vrot.slane %v1927_v35, 2  ;;  %v2169_v6 = vmul.f32 %v3504_v44, %v3696_v20  ;;  %v2170_v53 = vmul.f32 %v3630_v48, %v3504_v44 }
 0x11b   : > { %v1883_v21 = vadd.f32 %v1791_v58, %v1602_v52  ;;  %v1884_v47 = vadd.f32 %v1793_v25, %v1603_v56  ;;  %v2171_v59 = vmul.f32 %v3504_v44, %v3660_v12  ;;  %v2035_v63 = vsel %vm1758_vm4, %v2033_v60, %v2034_v57 }
 0x11c   : > { %v2037_v11 = vsel %vm1758_vm4, %v2034_v57, %v2036_v16  ;;  %v2277_v8 = vrot.slane %v2169_v6, 2  ;;  %v4524_v18 = vunpack.c.l.bf16 %v3250_v3  ;;  %v2278_v13 = vrot.slane %v2170_v53, 2 }
 0x11d   : > { %v2127_v46 = vadd.f32 %v2035_v63, %v1883_v21  ;;  %v2128_v9 = vadd.f32 %v2037_v11, %v1884_v47  ;;  %v2280_v19 = vrot.slane %v2171_v59, 2  ;;  %v4526_v26 = vunpack.c.h.bf16 %v3250_v3 }
 0x11e   : > { %v681_v51 = vmul.f32 %v4246_v33, %v3472_v23  ;;  %v682_v50 = vmul.f32 %v4250_v41, %v3472_v23  ;;  %v749_v36 = vmul.f32 %v3477_v28, %v4390_v61  ;;  %v2279_v55 = vsel %vm1758_vm4, %v2277_v8, %v2278_v13 }
 0x11f   : > { %v2281_v40 = vsel %vm1758_vm4, %v2278_v13, %v2280_v19  ;;  %v750_v62 = vmul.f32 %v3477_v28, %v4392_v14  ;;  %v817_v29 = vmul.f32 %v4524_v18, %v3487_v34  ;;  %v2371_v31 = vadd.f32 %v2279_v55, %v2127_v46  ;;  %v4561_v13 = vld [vmem:[#allocation2 + $0xc0] sm:$0xe] }
 0x120   : > { %v2372_v0 = vadd.f32 %v2281_v40, %v2128_v9  ;;  %v781_v2 = vadd.f32 %v749_v36, %v681_v51  ;;  %v818_v35 = vmul.f32 %v4526_v26, %v3487_v34  ;;  %v4542_v56 = vunpack.c.l.bf16 %v869_v5 }
 0x121   : > { %v782_v52 = vadd.f32 %v750_v62, %v682_v50  ;;  %v935_v58 = vmul.f32 %v4246_v33, %v3467_v17  ;;  %v936_v60 = vmul.f32 %v4250_v41, %v3467_v17  ;;  %v2410_v3 = vadd.f32 %v4126_v38, %v2371_v31 }
 0x122   : > { %v2411_v25 = vadd.f32 %v4126_v38, %v2372_v0  ;;  %v849_v57 = vadd.f32 %v817_v29, %v781_v2  ;;  %v937_v16 = vmul.f32 %v3467_v17, %v4266_v32  ;;  %v1180_v53 = vmul.f32 %v3491_v37, %v4390_v61 }
 0x123   : > { %v850_v6 = vadd.f32 %v818_v35, %v782_v52  ;;  %v1060_v21 = vrot.slane %v935_v58, 1  ;;  %v1061_v47 = vrot.slane %v936_v60, 1  ;;  %v2442_v59 = vmax.f32 %v2410_v3, 0.0 }
 0x124   : > { %v2443_v63 = vmax.f32 %v2411_v25, 0.0  ;;  %v1063_v33 = vrot.slane %v937_v16, 1  ;;  %v1181_v11 = vmul.f32 %v3491_v37, %v4392_v14  ;;  %v1182_v38 = vmul.f32 %v3491_v37, %v4408_v49 }
 0x125   : > { %v1062_v8 = vsel %vm989_vm3, %v1060_v21, %v1061_v47  ;;  %v1304_v46 = vrot.slane %v1180_v53, 1  ;;  %v1424_v9 = vmul.f32 %v4524_v18, %v3500_v42  ;;  %v1425_v40 = vmul.f32 %v4526_v26, %v3500_v42 }
 0x126   : > { %v2468_v19 = vpack.c.bf16 %v2443_v63, %v2442_v59  ;;  %v1064_v51 = vsel %vm989_vm3, %v1061_v47, %v1063_v33  ;;  %v1130_v50 = vadd.f32 %v1062_v8, %v849_v57  ;;  %v1305_v36 = vrot.slane %v1181_v11, 1 }
 0x127   : > { %v1131_v5 = vadd.f32 %v1064_v51, %v850_v6  ;;  %v1307_v55 = vrot.slane %v1182_v38, 1  ;;  %v1426_v62 = vmul.f32 %v3500_v42, %v4542_v56  ;;  %v1548_v31 = vrot.slane %v1424_v9, 1 }
 0x128   : > { %3297 = vmatprep.mubr.msk.bf16.mxu0 %vm2486_vm5, %v2468_v19  ;;  %v1306_v29 = vsel %vm989_vm3, %v1304_v46, %v1305_v36  ;;  %v1656_v0 = vunpack.c.l.bf16 %v4561_v13  ;;  %v1704_v2 = vmul.f32 %v3479_v30, %v4292_v10  ;;  %v1549_v58 = vrot.slane %v1425_v40, 1 }
 0x129   : > { %v1308_v35 = vsel %vm989_vm3, %v1305_v36, %v1307_v55  ;;  %v1374_v52 = vadd.f32 %v1306_v29, %v1130_v50  ;;  %v1551_v60 = vrot.slane %v1426_v62, 1  ;;  %v1705_v25 = vmul.f32 %v4250_v41, %v3479_v30 }
 0x12a   : > { %v1375_v3 = vadd.f32 %v1308_v35, %v1131_v5  ;;  %v1706_v57 = vmul.f32 %v3479_v30, %v4266_v32  ;;  %v1829_v16 = vrot.slane %v1704_v2, 2  ;;  %v1550_v6 = vsel %vm989_vm3, %v1548_v31, %v1549_v58 }
 0x12b   : > { %v1552_v21 = vsel %vm989_vm3, %v1549_v58, %v1551_v60  ;;  %v1949_v10 = vmul.f32 %v3502_v43, %v4434_v45  ;;  %v1950_v47 = vmul.f32 %v3502_v43, %v4392_v14  ;;  %v1618_v53 = vadd.f32 %v1550_v6, %v1374_v52 }
 0x12c   : > { %v1619_v59 = vadd.f32 %v1552_v21, %v1375_v3  ;;  %v1830_v63 = vrot.slane %v1705_v25, 2  ;;  %v1832_v33 = vrot.slane %v1706_v57, 2  ;;  %v1951_v41 = vmul.f32 %v3502_v43, %v4408_v49 }
 0x12d   : > { %v2073_v11 = vrot.slane %v1949_v10, 2  ;;  %v2074_v32 = vrot.slane %v1950_v47, 2  ;;  %v2193_v8 = vmul.f32 %v3504_v44, %v1656_v0  ;;  %v2194_v9 = vmul.f32 %v4526_v26, %v3504_v44 }
 0x12e   : > { %v1831_v38 = vsel %vm1758_vm4, %v1829_v16, %v1830_v63  ;;  %v1833_v46 = vsel %vm1758_vm4, %v1830_v63, %v1832_v33  ;;  %v2195_v19 = vmul.f32 %v3504_v44, %v4542_v56  ;;  %v2076_v5 = vrot.slane %v1951_v41, 2  ;;  %v4618_v63 = vld [vmem:[%s4823_s5] ss:$0 sm:$0xff] }
 0x12f   : > { %v1899_v51 = vadd.f32 %v1831_v38, %v1618_v53  ;;  %v1900_v50 = vadd.f32 %v1833_v46, %v1619_v59  ;;  %v2075_v36 = vsel %vm1758_vm4, %v2073_v11, %v2074_v32  ;;  %v2317_v55 = vrot.slane %v2193_v8, 2 }
 0x130   : > { %v2318_v40 = vrot.slane %v2194_v9, 2  ;;  %v2320_v62 = vrot.slane %v2195_v19, 2  ;;  %v667_v29 = vmul.f32 %v3472_v23, %v4318_v22  ;;  %v2077_v31 = vsel %vm1758_vm4, %v2074_v32, %v2076_v5 }
 0x131   : > { %v2143_v2 = vadd.f32 %v2075_v36, %v1899_v51  ;;  %v668_v35 = vmul.f32 %v3472_v23, %v4321_v27  ;;  %v735_v52 = vmul.f32 %v3627_v39, %v3477_v28  ;;  %v2144_v58 = vadd.f32 %v2077_v31, %v1900_v50 }
 0x132   : > { %v2319_v60 = vsel %vm1758_vm4, %v2317_v55, %v2318_v40  ;;  %v2321_v3 = vsel %vm1758_vm4, %v2318_v40, %v2320_v62  ;;  %v736_v25 = vmul.f32 %v3630_v48, %v3477_v28  ;;  %v803_v6 = vmul.f32 %v3487_v34, %v3642_v54 }
 0x133   : > { %v2387_v57 = vadd.f32 %v2319_v60, %v2143_v2  ;;  %v767_v16 = vadd.f32 %v735_v52, %v667_v29  ;;  %v804_v21 = vmul.f32 %v3487_v34, %v3645_v1  ;;  %v2388_v10 = vadd.f32 %v2321_v3, %v2144_v58 }
 0x134   : > { %v768_v47 = vadd.f32 %v736_v25, %v668_v35  ;;  %v914_v53 = vmul.f32 %v3467_v17, %v4318_v22  ;;  %v915_v59 = vmul.f32 %v3467_v17, %v4321_v27  ;;  %v916_v11 = vmul.f32 %v3467_v17, %v4337_v4 }
 0x135   : > { %v2426_v33 = vadd.f32 %v4618_v63, %v2387_v57  ;;  %v835_v41 = vadd.f32 %v803_v6, %v767_v16  ;;  %v1159_v32 = vmul.f32 %v3627_v39, %v3491_v37  ;;  %v2427_v8 = vadd.f32 %v4618_v63, %v2388_v10 }
 0x136   : > { %v836_v22 = vadd.f32 %v804_v21, %v768_v47  ;;  %v1025_v38 = vrot.slane %v914_v53, 1  ;;  %v1026_v46 = vrot.slane %v915_v59, 1  ;;  %v1028_v19 = vrot.slane %v916_v11, 1 }
 0x137   : > { %v2458_v9 = vmax.f32 %v2426_v33, 0.0  ;;  %v1160_v51 = vmul.f32 %v3630_v48, %v3491_v37  ;;  %v1161_v50 = vmul.f32 %v3491_v37, %v3660_v12  ;;  %v4630_v36 = vpop.f32.mrb[0].mxu0  ;;  %v2459_v5 = vmax.f32 %v2427_v8, 0.0 }
 0x138   : > { %v1027_v55 = vsel %vm989_vm3, %v1025_v38, %v1026_v46  ;;  %v1269_v40 = vrot.slane %v1159_v32, 1  ;;  %v1403_v39 = vmul.f32 %v3500_v42, %v3642_v54  ;;  %v4635_v62 = vpop.f32.mrb[1].mxu0  ;;  %v1029_v29 = vsel %vm989_vm3, %v1026_v46, %v1028_v19 }
 0x139   : > { %v1116_v31 = vadd.f32 %v1027_v55, %v835_v41  ;;  %v1270_v2 = vrot.slane %v1160_v51, 1  ;;  %v1272_v35 = vrot.slane %v1161_v50, 1  ;;  %v4638_v52 = vpop.f32.mrb[2].mxu0  ;;  %v2476_v58 = vpack.c.bf16 %v2459_v5, %v2458_v9  ;;  %v611_v5 = vld [vmem:[#allocation2 + $0xcc] sm:$0xff]  }
 0x13a   : > { %v1117_v60 = vadd.f32 %v1029_v29, %v836_v22  ;;  %v1404_v3 = vmul.f32 %v3500_v42, %v3645_v1  ;;  %v1405_v25 = vmul.f32 %v3500_v42, %v3663_v15  ;;  %v4644_v57 = vpop.f32.mrb[3].mxu0  ;;  %v1513_v6 = vrot.slane %v1403_v39, 1 }
 0x13b   : > { %v1271_v54 = vsel %vm989_vm3, %v1269_v40, %v1270_v2  ;;  %v1273_v16 = vsel %vm989_vm3, %v1270_v2, %v1272_v35  ;;  %v1683_v21 = vmul.f32 %v3479_v30, %v4363_v7  ;;  %3313 = vmatprep.mubr.msk.bf16.mxu1 %vm2486_vm5, %v2476_v58  ;;  %v1684_v33 = vmul.f32 %v3479_v30, %v4321_v27 }
 0x13c   : > { %v1360_v10 = vadd.f32 %v1271_v54, %v1116_v31  ;;  %v1361_v47 = vadd.f32 %v1273_v16, %v1117_v60  ;;  %v1514_v53 = vrot.slane %v1404_v3, 1  ;;  %v1516_v59 = vrot.slane %v1405_v25, 1  ;;  %v4677_v16 = vld [vmem:[#allocation2 + $0xd4] sm:$0x1] }
 0x13d   : > { %v1685_v41 = vmul.f32 %v3479_v30, %v4337_v4  ;;  %v1794_v11 = vrot.slane %v1683_v21, 2  ;;  %v1928_v32 = vmul.f32 %v3502_v43, %v3696_v20  ;;  %v1929_v22 = vmul.f32 %v3630_v48, %v3502_v43 }
 0x13e   : > { %v1515_v8 = vsel %vm989_vm3, %v1513_v6, %v1514_v53  ;;  %v1517_v7 = vsel %vm989_vm3, %v1514_v53, %v1516_v59  ;;  %v1930_v38 = vmul.f32 %v3502_v43, %v3660_v12  ;;  %v1795_v27 = vrot.slane %v1684_v33, 2 }
 0x13f   : > { %v1604_v46 = vadd.f32 %v1515_v8, %v1360_v10  ;;  %v1605_v9 = vadd.f32 %v1517_v7, %v1361_v47  ;;  %v1797_v19 = vrot.slane %v1685_v41, 2  ;;  %v2038_v51 = vrot.slane %v1928_v32, 2 }
 0x140   : > { %v2039_v4 = vrot.slane %v1929_v22, 2  ;;  %v2041_v50 = vrot.slane %v1930_v38, 2  ;;  %v2172_v20 = vmul.f32 %v3504_v44, %v3699_v24  ;;  %v1796_v55 = vsel %vm1758_vm4, %v1794_v11, %v1795_v27 }
 0x141   : > { %v1798_v40 = vsel %vm1758_vm4, %v1795_v27, %v1797_v19  ;;  %v2173_v48 = vmul.f32 %v3504_v44, %v3645_v1  ;;  %v2174_v12 = vmul.f32 %v3504_v44, %v3663_v15  ;;  %v1885_v39 = vadd.f32 %v1796_v55, %v1604_v46 }
 0x142   : > { %v1886_v29 = vadd.f32 %v1798_v40, %v1605_v9  ;;  %v2040_v31 = vsel %vm1758_vm4, %v2038_v51, %v2039_v4  ;;  %v2042_v2 = vsel %vm1758_vm4, %v2039_v4, %v2041_v50  ;;  %v2282_v35 = vrot.slane %v2172_v20, 2 }
 0x143   : > { %v2283_v58 = vrot.slane %v2173_v48, 2  ;;  %v2285_v24 = vrot.slane %v2174_v12, 2  ;;  %v647_v60 = vunpack.c.l.bf16 %v611_v5  ;;  %v2129_v3 = vadd.f32 %v2040_v31, %v1885_v39  ;;  %v1639_v12 = vld [vmem:[#allocation2 + $0xcc] sm:$0xe] }
 0x144   : > { %v2130_v25 = vadd.f32 %v2042_v2, %v1886_v29  ;;  %v4673_v54 = vunpack.c.h.bf16 %v611_v5  ;;  %v683_v1 = vmul.f32 %v3472_v23, %v4390_v61  ;;  %v684_v21 = vmul.f32 %v3472_v23, %v4392_v14 }
 0x145   : > { %v2284_v15 = vsel %vm1758_vm4, %v2282_v35, %v2283_v58  ;;  %v2286_v6 = vsel %vm1758_vm4, %v2283_v58, %v2285_v24  ;;  %v751_v10 = vmul.f32 %v4524_v18, %v3477_v28  ;;  %v752_v59 = vmul.f32 %v4526_v26, %v3477_v28 }
 0x146   : > { %v2373_v47 = vadd.f32 %v2284_v15, %v2129_v3  ;;  %v2374_v53 = vadd.f32 %v2286_v6, %v2130_v25  ;;  %v819_v33 = vmul.f32 %v3487_v34, %v647_v60  ;;  %v820_v11 = vmul.f32 %v3487_v34, %v4673_v54 }
 0x147   : > { %v783_v41 = vadd.f32 %v751_v10, %v683_v1  ;;  %v888_v32 = vunpack.c.l.bf16 %v4677_v16  ;;  %v938_v8 = vmul.f32 %v3467_v17, %v4390_v61  ;;  %v784_v22 = vadd.f32 %v752_v59, %v684_v21 }
 0x148   : > { %v2412_v23 = vadd.f32 %v4618_v63, %v2373_v47  ;;  %v2413_v7 = vadd.f32 %v4618_v63, %v2374_v53  ;;  %v939_v38 = vmul.f32 %v3467_v17, %v4392_v14  ;;  %v940_v46 = vmul.f32 %v3467_v17, %v4408_v49 }
 0x149   : > { %v851_v28 = vadd.f32 %v819_v33, %v783_v41  ;;  %v1065_v9 = vrot.slane %v938_v8, 1  ;;  %v1183_v34 = vmul.f32 %v4524_v18, %v3491_v37  ;;  %v852_v51 = vadd.f32 %v820_v11, %v784_v22 }
 0x14a   : > { %v2444_v27 = vmax.f32 %v2412_v23, 0.0  ;;  %v2445_v19 = vmax.f32 %v2413_v7, 0.0  ;;  %v1066_v61 = vrot.slane %v939_v38, 1  ;;  %v1068_v4 = vrot.slane %v940_v46, 1 }
 0x14b   : > { %v1184_v50 = vmul.f32 %v4526_v26, %v3491_v37  ;;  %v1185_v20 = vmul.f32 %v3491_v37, %v4542_v56  ;;  %v1309_v5 = vrot.slane %v1183_v34, 1  ;;  %v3303_v55 = vpop.f32.mrb[0].mxu1  ;;  %v1427_v48 = vmul.f32 %v3500_v42, %v647_v60 }
 0x14c   : > { %v2469_v40 = vpack.c.bf16 %v2445_v19, %v2444_v27  ;;  %v1067_v17 = vsel %vm989_vm3, %v1065_v9, %v1066_v61  ;;  %v1428_v18 = vmul.f32 %v3500_v42, %v4673_v54  ;;  %v2637_v39 = vpop.f32.mrb[1].mxu1  ;;  %v1069_v29 = vsel %vm989_vm3, %v1066_v61, %v1068_v4 }
 0x14d   : > { %v1132_v31 = vadd.f32 %v1067_v17, %v851_v28  ;;  %v1310_v2 = vrot.slane %v1184_v50, 1  ;;  %v1312_v35 = vrot.slane %v1185_v20, 1  ;;  %v3304_v58 = vpop.f32.mrb[2].mxu1  ;;  %v1133_v37 = vadd.f32 %v1069_v29, %v852_v51 }
 0x14e   : > { %3298 = vmatmul.mubr.msk.bf16.gmra.mrb[12].mxu0 %vm2486_vm5, %v2469_v40  ;;  %v1429_v24 = vmul.f32 %v3500_v42, %v888_v32  ;;  %v1553_v3 = vrot.slane %v1427_v48, 1  ;;  %v1554_v60 = vrot.slane %v1428_v18, 1  ;;  %v2640_v25 = vpop.f32.mrb[3].mxu1  ;;  %v1657_v6 = vunpack.c.l.bf16 %v1639_v12 }
 0x14f   : > { %v1311_v1 = vsel %vm989_vm3, %v1309_v5, %v1310_v2  ;;  %v1313_v15 = vsel %vm989_vm3, %v1310_v2, %v1312_v35  ;;  %v1707_v21 = vmul.f32 %v3479_v30, %v4434_v45  ;;  %v1708_v33 = vmul.f32 %v3479_v30, %v4392_v14 }
 0x150   : > { %v1376_v10 = vadd.f32 %v1311_v1, %v1132_v31  ;;  %v1377_v47 = vadd.f32 %v1313_v15, %v1133_v37  ;;  %v1555_v53 = vsel %vm989_vm3, %v1553_v3, %v1554_v60  ;;  %v1556_v59 = vrot.slane %v1429_v24, 1 }
 0x151   : > { %v1709_v42 = vmul.f32 %v3479_v30, %v4408_v49  ;;  %v1834_v41 = vrot.slane %v1707_v21, 2  ;;  %v1952_v11 = vmul.f32 %v3502_v43, %v1656_v0  ;;  %v1953_v45 = vmul.f32 %v4526_v26, %v3502_v43  ;;  %v4737_v0 = vld [vmem:[%s4824_s6] ss:$0 sm:$0xff] }
 0x152   : > { %v1557_v8 = vsel %vm989_vm3, %v1554_v60, %v1556_v59  ;;  %v1620_v23 = vadd.f32 %v1555_v53, %v1376_v10  ;;  %v1954_v7 = vmul.f32 %v3502_v43, %v4542_v56  ;;  %v1835_v38 = vrot.slane %v1708_v33, 2 }
 0x153   : > { %v1621_v22 = vadd.f32 %v1557_v8, %v1377_v47  ;;  %v1837_v14 = vrot.slane %v1709_v42, 2  ;;  %v2078_v28 = vrot.slane %v1952_v11, 2  ;;  %v2079_v46 = vrot.slane %v1953_v45, 2 }
 0x154   : > { %v2081_v30 = vrot.slane %v1954_v7, 2  ;;  %v2196_v49 = vmul.f32 %v3504_v44, %v1657_v6  ;;  %v2197_v13 = vmul.f32 %v3504_v44, %v4673_v54  ;;  %v1836_v26 = vsel %vm1758_vm4, %v1834_v41, %v1835_v38 }
 0x155   : > { %v1838_v43 = vsel %vm1758_vm4, %v1835_v38, %v1837_v14  ;;  %v2198_v56 = vmul.f32 %v3504_v44, %v888_v32  ;;  %v1901_v9 = vadd.f32 %v1836_v26, %v1620_v23  ;;  %v2080_v27 = vsel %vm1758_vm4, %v2078_v28, %v2079_v46 }
 0x156   : > { %v1902_v34 = vadd.f32 %v1838_v43, %v1621_v22  ;;  %v2082_v54 = vsel %vm1758_vm4, %v2079_v46, %v2081_v30  ;;  %v2322_v19 = vrot.slane %v2196_v49, 2  ;;  %v2323_v51 = vrot.slane %v2197_v13, 2 }
 0x157   : > { %v2325_v61 = vrot.slane %v2198_v56, 2  ;;  %v2582_v4 = vadd.f32 %v4630_v36, %v4737_v0  ;;  %v2145_v50 = vadd.f32 %v2080_v27, %v1901_v9  ;;  %v2646_v5 = vadd.f32 %v3303_v55, %v4737_v0 }
 0x158   : > { %v2146_v20 = vadd.f32 %v2082_v54, %v1902_v34  ;;  %v2324_v16 = vsel %vm1758_vm4, %v2322_v19, %v2323_v51  ;;  %v2574_v32 = vadd.f32 %v4737_v0, %v4635_v62  ;;  %v2585_v40 = vadd.f32 %v4638_v52, %v4737_v0 }
 0x159   : > { %v2326_v44 = vsel %vm1758_vm4, %v2323_v51, %v2325_v61  ;;  %v2389_v17 = vadd.f32 %v2324_v16, %v2145_v50  ;;  %v2638_v18 = vadd.f32 %v4737_v0, %v2637_v39  ;;  %v2702_v36 = vmax.f32 %v2582_v4, 0.0 }
 0x15a   : > { %v2390_v48 = vadd.f32 %v2326_v44, %v2146_v20  ;;  %v2703_v12 = vmax.f32 %v2585_v40, 0.0  ;;  %v2649_v29 = vadd.f32 %v3304_v58, %v4737_v0  ;;  %v2577_v55 = vadd.f32 %v4737_v0, %v4644_v57 }
 0x15b   : > { %v2428_v31 = vadd.f32 %v4618_v63, %v2389_v17  ;;  %v2718_v62 = vmax.f32 %v2646_v5, 0.0  ;;  %v2641_v52 = vadd.f32 %v4737_v0, %v2640_v25  ;;  %v2700_v39 = vmax.f32 %v2574_v32, 0.0 }
 0x15c   : > { %v2429_v2 = vadd.f32 %v4618_v63, %v2390_v48  ;;  %v3171_v35 = vpack.c.bf16 %v2703_v12, %v2702_v36  ;;  %v2719_v58 = vmax.f32 %v2649_v29, 0.0  ;;  %v2701_v57 = vmax.f32 %v2577_v55, 0.0 }
 0x15d   : > { %v2460_v37 = vmax.f32 %v2428_v31, 0.0  ;;  %v2716_v3 = vmax.f32 %v2638_v18, 0.0  ;;  %v2717_v63 = vmax.f32 %v2641_v52, 0.0 }
 0x15e   : > { %v2461_v24 = vmax.f32 %v2429_v2, 0.0  ;;  %3251 = vst [vmem:[%s4765_s27 + $0x8] sm:$0xff] %v3171_v35   ;;  %v3211_v60 = vpack.c.bf16 %v2719_v58, %v2718_v62  ;;  %v3166_v1 = vpack.c.bf16 %v2701_v57, %v2700_v39 }
 0x15f   : > { %v3206_v6 = vpack.c.bf16 %v2717_v63, %v2716_v3 }
 0x160   : > { %v2477_v15 = vpack.c.bf16 %v2461_v24, %v2460_v37  ;;  %3259 = vst [vmem:[%s4765_s27 + $0x48] sm:$0xff] %v3211_v60   ;;  %3167 = vst [vmem:[%s4765_s27] sm:$0xff] %v3166_v1  }
 0x161   : > { %3258 = vst [vmem:[%s4765_s27 + $0x40] sm:$0xff] %v3206_v6  }
 0x162   : > { %3314 = vmatmul.mubr.msk.bf16.gmra.mrb[12].mxu1 %vm2486_vm5, %v2477_v15 }
 0x185   : > { %v3291_v25 = vpop.f32.mrb[4].mxu0 }
 0x186   : > { %v2598_v21 = vadd.f32 %v3291_v25, %v4737_v0  ;;  %v2589_v10 = vpop.f32.mrb[5].mxu0 }
 0x187   : > { %v2590_v47 = vadd.f32 %v4737_v0, %v2589_v10  ;;  %v3292_v53 = vpop.f32.mrb[6].mxu0 }
 0x188   : > { %v2601_v59 = vadd.f32 %v3292_v53, %v4737_v0  ;;  %v2592_v33 = vpop.f32.mrb[7].mxu0  ;;  %v2706_v41 = vmax.f32 %v2598_v21, 0.0 }
 0x189   : > { %v2593_v42 = vadd.f32 %v4737_v0, %v2592_v33  ;;  %v2704_v8 = vmax.f32 %v2590_v47, 0.0 }
 0x18a   : > { %v2707_v11 = vmax.f32 %v2601_v59, 0.0 }
 0x18b   : > { %v2705_v23 = vmax.f32 %v2593_v42, 0.0 }
 0x18c   : > { %v3181_v45 = vpack.c.bf16 %v2707_v11, %v2706_v41 }
 0x18d   : > { %v3176_v7 = vpack.c.bf16 %v2705_v23, %v2704_v8 }
 0x18e   : > { %3253 = vst [vmem:[%s4765_s27 + $0x18] sm:$0xff] %v3181_v45  }
 0x18f   : > { %3252 = vst [vmem:[%s4765_s27 + $0x10] sm:$0xff] %v3176_v7  }
 0x199   : > { %v3307_v22 = vpop.f32.mrb[4].mxu1 }
 0x19a   : > { %v2662_v38 = vadd.f32 %v3307_v22, %v4737_v0  ;;  %v2653_v14 = vpop.f32.mrb[5].mxu1 }
 0x19b   : > { %v2654_v28 = vadd.f32 %v4737_v0, %v2653_v14  ;;  %v3308_v46 = vpop.f32.mrb[6].mxu1 }
 0x19c   : > { %v2665_v30 = vadd.f32 %v3308_v46, %v4737_v0  ;;  %v2656_v49 = vpop.f32.mrb[7].mxu1  ;;  %v2722_v26 = vmax.f32 %v2662_v38, 0.0 }
 0x19d   : > { %v2657_v13 = vadd.f32 %v4737_v0, %v2656_v49  ;;  %v2720_v56 = vmax.f32 %v2654_v28, 0.0 }
 0x19e   : > { %v2723_v43 = vmax.f32 %v2665_v30, 0.0 }
 0x19f   : > { %v2721_v9 = vmax.f32 %v2657_v13, 0.0 }
 0x1a0   : > { %v3221_v34 = vpack.c.bf16 %v2723_v43, %v2722_v26 }
 0x1a1   : > { %v3216_v27 = vpack.c.bf16 %v2721_v9, %v2720_v56 }
 0x1a2   : > { %3261 = vst [vmem:[%s4765_s27 + $0x58] sm:$0xff] %v3221_v34  }
 0x1a3   : > { %3260 = vst [vmem:[%s4765_s27 + $0x50] sm:$0xff] %v3216_v27  }
 0x1d5   : > { %v3295_v54 = vpop.f32.mrb[8].mxu0 }
 0x1d6   : > { %v2614_v19 = vadd.f32 %v3295_v54, %v4737_v0  ;;  %v2605_v51 = vpop.f32.mrb[9].mxu0 }
 0x1d7   : > { %v2606_v61 = vadd.f32 %v4737_v0, %v2605_v51  ;;  %v3296_v4 = vpop.f32.mrb[10].mxu0 }
 0x1d8   : > { %v2617_v50 = vadd.f32 %v3296_v4, %v4737_v0  ;;  %v2608_v20 = vpop.f32.mrb[11].mxu0  ;;  %v2710_v16 = vmax.f32 %v2614_v19, 0.0 }
 0x1d9   : > { %v2609_v5 = vadd.f32 %v4737_v0, %v2608_v20  ;;  %v2708_v32 = vmax.f32 %v2606_v61, 0.0 }
 0x1da   : > { %v2711_v44 = vmax.f32 %v2617_v50, 0.0 }
 0x1db   : > { %v2709_v40 = vmax.f32 %v2609_v5, 0.0 }
 0x1dc   : > { %v3191_v17 = vpack.c.bf16 %v2711_v44, %v2710_v16 }
 0x1dd   : > { %v3186_v48 = vpack.c.bf16 %v2709_v40, %v2708_v32 }
 0x1de   : > { %3255 = vst [vmem:[%s4765_s27 + $0x28] sm:$0xff] %v3191_v17  }
 0x1df   : > { %3254 = vst [vmem:[%s4765_s27 + $0x20] sm:$0xff] %v3186_v48  }
 0x1e8   : > { %v3311_v18 = vpop.f32.mrb[8].mxu1 }
 0x1e9   : > { %v2678_v36 = vadd.f32 %v3311_v18, %v4737_v0  ;;  %v2669_v12 = vpop.f32.mrb[9].mxu1 }
 0x1ea   : > { %v2670_v29 = vadd.f32 %v4737_v0, %v2669_v12  ;;  %v3312_v55 = vpop.f32.mrb[10].mxu1 }
 0x1eb   : > { %v2681_v31 = vadd.f32 %v3312_v55, %v4737_v0  ;;  %v2672_v2 = vpop.f32.mrb[11].mxu1  ;;  %v2726_v52 = vmax.f32 %v2678_v36, 0.0 }
 0x1ec   : > { %v2673_v62 = vadd.f32 %v4737_v0, %v2672_v2  ;;  %v2724_v35 = vmax.f32 %v2670_v29, 0.0 }
 0x1ed   : > { %v2727_v39 = vmax.f32 %v2681_v31, 0.0 }
 0x1ee   : > { %v2725_v58 = vmax.f32 %v2673_v62, 0.0 }
 0x1ef   : > { %v3231_v57 = vpack.c.bf16 %v2727_v39, %v2726_v52 }
 0x1f0   : > { %v3226_v37 = vpack.c.bf16 %v2725_v58, %v2724_v35 }
 0x1f1   : > { %3263 = vst [vmem:[%s4765_s27 + $0x68] sm:$0xff] %v3231_v57  }
 0x1f2   : > { %3262 = vst [vmem:[%s4765_s27 + $0x60] sm:$0xff] %v3226_v37  }
 0x221   : > { %v3299_v24 = vpop.f32.mrb[12].mxu0 }
 0x222   : > { %v2630_v3 = vadd.f32 %v3299_v24, %v4737_v0  ;;  %v2621_v63 = vpop.f32.mrb[13].mxu0 }
 0x223   : > { %v2622_v60 = vadd.f32 %v4737_v0, %v2621_v63  ;;  %v3300_v1 = vpop.f32.mrb[14].mxu0 }
 0x224   : > { %v2633_v15 = vadd.f32 %v3300_v1, %v4737_v0  ;;  %v2624_v6 = vpop.f32.mrb[15].mxu0  ;;  %v2714_v21 = vmax.f32 %v2630_v3, 0.0 }
 0x225   : > { %v2625_v25 = vadd.f32 %v4737_v0, %v2624_v6  ;;  %v2712_v47 = vmax.f32 %v2622_v60, 0.0 }
 0x226   : > { %v2715_v10 = vmax.f32 %v2633_v15, 0.0 }
 0x227   : > { %v2713_v53 = vmax.f32 %v2625_v25, 0.0 }
 0x228   : > { %v3201_v59 = vpack.c.bf16 %v2715_v10, %v2714_v21 }
 0x229   : > { %v3196_v33 = vpack.c.bf16 %v2713_v53, %v2712_v47 }
 0x22a   : > { %3257 = vst [vmem:[%s4765_s27 + $0x38] sm:$0xff] %v3201_v59  }
 0x22b   : > { %3256 = vst [vmem:[%s4765_s27 + $0x30] sm:$0xff] %v3196_v33  }
 0x235   : > { %v3315_v42 = vpop.f32.mrb[12].mxu1 }
 0x236   : > { %v2694_v41 = vadd.f32 %v3315_v42, %v4737_v0  ;;  %v2685_v11 = vpop.f32.mrb[13].mxu1 }
 0x237   : > { %v2686_v8 = vadd.f32 %v4737_v0, %v2685_v11  ;;  %v3316_v23 = vpop.f32.mrb[14].mxu1 }
 0x238   : > { %v2697_v45 = vadd.f32 %v3316_v23, %v4737_v0  ;;  %v2688_v7 = vpop.f32.mrb[15].mxu1  ;;  %v2730_v38 = vmax.f32 %v2694_v41, 0.0 }
 0x239   : > { %v2689_v22 = vadd.f32 %v4737_v0, %v2688_v7  ;;  %v2728_v28 = vmax.f32 %v2686_v8, 0.0 }
 0x23a   : > { %v2731_v14 = vmax.f32 %v2697_v45, 0.0 }
 0x23b   : > { %v2729_v46 = vmax.f32 %v2689_v22, 0.0 }
 0x23c   : > { %v3241_v30 = vpack.c.bf16 %v2731_v14, %v2730_v38 }
 0x23d   : > { %v3236_v49 = vpack.c.bf16 %v2729_v46, %v2728_v28 }
 0x23e   : > { %3265 = vst [vmem:[%s4765_s27 + $0x78] sm:$0xff] %v3241_v30  }
 0x23f   : > { %3264 = vst [vmem:[%s4765_s27 + $0x70] sm:$0xff] %v3236_v49  }
 0x240 PF: > { %s17_s2 = sadd.s32 1, %s3371_s2   ;;  %s4826_s24 = smov %s3367_s1 }
 0x241   : > { %p14_p5 = scmp.ge.s32.totalorder %s17_s2, 4   ;;  %s4827_s1 = smov %s4829_s25 }
 0x243   :  { %16 = sbr.rel (!%p14_p5) target bundleno = 2 (0x2), region = 86 }

</bundles_post_ra>
